<compile_context>
chip_gen: v7x
topology: tpu7x:2x2x1
jax: 0.10.0
libtpu: 0.0.40
codegen_flags: <defaults>
</compile_context>

<pallas_src>
import functools

import jax
import jax.numpy as jnp
from jax.experimental import pallas as pl
from jax.experimental.pallas import tpu as pltpu


def _round_up(a, b):
    return ((a + b - 1) // b) * b


def _padded_bytes(rows, cols, itemsize):
    """VMEM footprint of a (rows, cols) block incl. (8, 128) tile padding."""
    return _round_up(rows, 8) * _round_up(cols, 128) * itemsize


def _pick_tile_m(n, requested, h_itemsize, x_itemsize, hidden, feat):
    """Lane-aligned node-tile size giving >=4 grid steps and fitting VMEM.

    >= 4 steps means >= 2 pipelined steps per v7x TensorCore (megacore) and a
    steady-state pipeline on single-TC v5e/v6e.  The VMEM budget is computed
    with (8, 128) lane/sublane padding because H and F are below 128.
    """
    cap = max(128, _round_up(-(-n // 4), 128))           # ~ceil(N/4) rows
    tile_m = max(128, min(_round_up(int(requested), 128), cap, 1024))
    budget = 24 * 1024 * 1024                            # safe on v5e/v6e/v7x
    while tile_m > 128:
        per_step = (2 * _padded_bytes(tile_m, hidden, h_itemsize)      # h x2
                    + 2 * _padded_bytes(tile_m, feat, x_itemsize)       # x x2
                    + 3 * _padded_bytes(tile_m, max(hidden, feat), 4))  # z/x_hat/sq
        if per_step <= budget:
            break
        tile_m -= 128
    return tile_m


def _squared_error_tile(h_ref, x_ref, w1_ref, b1_ref, w2_ref, b2_ref):
    """Decode one node tile and return per-element squared error (tm, F) f32."""
    # decoder layer 1: Linear + ReLU (bf16 MXU inputs, f32 accumulation).
    # Casts are done in-kernel on the VPU (no wrapper-side HBM round trip).
    h = h_ref[...].astype(jnp.bfloat16)
    z = jnp.dot(h, w1_ref[...], preferred_element_type=jnp.float32)
    z = jnp.maximum(z + b1_ref[...], 0.0)
    # decoder layer 2: Linear
    x_hat = jnp.dot(z.astype(jnp.bfloat16), w2_ref[...],
                    preferred_element_type=jnp.float32)
    x_hat = x_hat + b2_ref[...]
    diff = x_hat - x_ref[...].astype(jnp.float32)
    return diff * diff


def _per_node_loss_kernel(h_ref, x_ref, w1_ref, b1_ref, w2_ref, b2_ref,
                          ones_ref, loss_ref, *, inv_feat):
    """Inference: per-node MSE, written lane-dense as a (1, tile_m) row."""
    sq = _squared_error_tile(h_ref, x_ref, w1_ref, b1_ref, w2_ref, b2_ref)
    # Feature-axis reduction on the MXU: (8, F) @ (tile_m, F)^T -> (8, tile_m).
    # Output column j depends only on node j, so any garbage in the ragged
    # tail rows stays in the tail columns, which the wrapper slices away.
    rows = jax.lax.dot_general(ones_ref[...], sq.astype(jnp.bfloat16),
                               (((1,), (1,)), ((), ())),
                               preferred_element_type=jnp.float32)
    loss_ref[...] = (rows[0:1, :] * inv_feat)[None, :, :]   # (1, 1, tile_m)


def _partial_sum_kernel(h_ref, x_ref, w1_ref, b1_ref, w2_ref, b2_ref,
                        ones_ref, psum_ref, *, n_valid, tile_m, has_tail):
    """Training: per-tile partial sum of squared errors as one (1, F) row."""
    sq = _squared_error_tile(h_ref, x_ref, w1_ref, b1_ref, w2_ref, b2_ref)
    if has_tail:
        # Zero the out-of-range tail rows with a select BEFORE the reduction
        # (possibly non-finite out-of-bounds garbage must never reach the MXU
        # accumulation as a multiplicand).
        row = (pl.program_id(0) * tile_m
               + jax.lax.broadcasted_iota(jnp.int32, sq.shape, 0))
        sq = jnp.where(row < n_valid, sq, 0.0)
    # Node-axis reduction on the MXU (K = tile_m is the only well-shaped
    # contraction here): (8, tile_m) ones @ (tile_m, F) -> (8, F), take row 0.
    psum = jax.lax.dot_general(ones_ref[...], sq.astype(jnp.bfloat16),
                               (((1,), (0,)), ((), ())),
                               preferred_element_type=jnp.float32)
    psum_ref[...] = psum[0:1, :][None, :, :]                 # (1, 1, F)


@functools.partial(jax.jit, static_argnames=("inference", "tile_m"))
def node_feat_reconstruction(h, x, params, *, inference, tile_m=1024):
    """Forward pass of NodeFeatReconstruction.

    Returns {'loss': scalar} when inference=False and {'loss': (N,) per-node
    losses} when inference=True.
    """
    w1, b1, w2, b2 = params
    N, H = h.shape
    F = x.shape[-1]

    # Resident decoder weights as bf16 MXU operands (tiny tensors; the
    # one-time wrapper cast is negligible).  h / x pass through untouched --
    # the kernel casts h to bf16 (MXU) and x to f32 (loss math) on the VPU,
    # so a caller that already holds bf16 activations halves those streams.
    w1_bf = w1.astype(jnp.bfloat16)
    w2_bf = w2.astype(jnp.bfloat16)
    b1_f = jnp.asarray(b1, jnp.float32).reshape(1, H)
    b2_f = jnp.asarray(b2, jnp.float32).reshape(1, F)

    tile_m = _pick_tile_m(N, tile_m, h.dtype.itemsize, x.dtype.itemsize, H, F)
    num_tiles = pl.cdiv(N, tile_m)
    n_pad = num_tiles * tile_m
    has_tail = n_pad != N

    in_specs = [
        pl.BlockSpec((tile_m, H), lambda i: (i, 0)),   # h tile
        pl.BlockSpec((tile_m, F), lambda i: (i, 0)),   # x tile
        pl.BlockSpec((H, H), lambda i: (0, 0)),        # W1 (resident)
        pl.BlockSpec((1, H), lambda i: (0, 0)),        # b1
        pl.BlockSpec((H, F), lambda i: (0, 0)),        # W2 (resident)
        pl.BlockSpec((1, F), lambda i: (0, 0)),        # b2
    ]
    # TODO(synk): at production H (1-4K), single-buffer the resident W1/W2
    # blocks (pipeline_mode=pl.Buffered(1)) and make vmem_limit_bytes /
    # tile_m generation-aware (v7x has 64 MiB VMEM vs 128 MiB on v5e/v6e);
    # at H=32 / F=64 the double-buffered weights are a few KB so this is
    # deferred in favour of guaranteed-clean compilation.
    compiler_params = pltpu.CompilerParams(
        dimension_semantics=("parallel",),
        vmem_limit_bytes=32 * 1024 * 1024,
    )
    flops = 2 * n_pad * H * (H + F) + 2 * 8 * n_pad * F + 4 * n_pad * F
    bytes_accessed = (N * H * h.dtype.itemsize + N * F * x.dtype.itemsize
                      + (H * H + H * F) * 2 + (H + F) * 4 + n_pad * 4)
    cost = pl.CostEstimate(flops=int(flops), transcendentals=0,
                           bytes_accessed=int(bytes_accessed))

    if inference:
        ones_red = jnp.ones((8, F), jnp.bfloat16)        # hoisted, resident
        kernel = functools.partial(_per_node_loss_kernel, inv_feat=1.0 / F)
        per_node = pl.pallas_call(
            kernel,
            out_shape=jax.ShapeDtypeStruct((num_tiles, 1, tile_m), jnp.float32),
            grid_spec=pltpu.PrefetchScalarGridSpec(
                num_scalar_prefetch=0,
                grid=(num_tiles,),
                in_specs=in_specs + [pl.BlockSpec((8, F), lambda i: (0, 0))],
                out_specs=pl.BlockSpec((1, 1, tile_m), lambda i: (i, 0, 0)),
            ),
            compiler_params=compiler_params,
            cost_estimate=cost,
        )(h, x, w1_bf, b1_f, w2_bf, b2_f, ones_red)
        return {"loss": per_node.reshape(n_pad)[:N]}

    # Training: only tiny per-tile partial-sum rows leave the kernel; the
    # scalar mean is finished with a trivial reduction (no N-sized writeback).
    ones_red = jnp.ones((8, tile_m), jnp.bfloat16)       # hoisted, resident
    kernel = functools.partial(_partial_sum_kernel, n_valid=N,
                               tile_m=tile_m, has_tail=has_tail)
    partial = pl.pallas_call(
        kernel,
        out_shape=jax.ShapeDtypeStruct((num_tiles, 1, F), jnp.float32),
        grid_spec=pltpu.PrefetchScalarGridSpec(
            num_scalar_prefetch=0,
            grid=(num_tiles,),
            in_specs=in_specs + [pl.BlockSpec((8, tile_m), lambda i: (0, 0))],
            out_specs=pl.BlockSpec((1, 1, F), lambda i: (i, 0, 0)),
        ),
        compiler_params=compiler_params,
        cost_estimate=cost,
    )(h, x, w1_bf, b1_f, w2_bf, b2_f, ones_red)
    return {"loss": jnp.sum(partial) / (N * F)}


def init_params(hidden, feat_dim, key):
    """Deterministic synthetic decoder parameters (shapes from __init__)."""
    k1, k2, k3, k4 = jax.random.split(key, 4)
    w1 = jax.random.normal(k1, (hidden, hidden), jnp.float32) * 0.1
    b1 = jax.random.normal(k2, (1, hidden), jnp.float32) * 0.01
    w2 = jax.random.normal(k3, (hidden, feat_dim), jnp.float32) * 0.1
    b2 = jax.random.normal(k4, (1, feat_dim), jnp.float32) * 0.01
    return (w1, b1, w2, b2)


def _reference_losses(h, x, params):
    """Plain-JAX reference along the same bf16-input / f32-accum dtype path."""
    w1, b1, w2, b2 = params
    z = jnp.dot(h.astype(jnp.bfloat16), w1.astype(jnp.bfloat16),
                preferred_element_type=jnp.float32) + b1
    z = jnp.maximum(z, 0.0)
    x_hat = jnp.dot(z.astype(jnp.bfloat16), w2.astype(jnp.bfloat16),
                    preferred_element_type=jnp.float32) + b2
    return jnp.mean((x_hat - x) ** 2, axis=-1)


if __name__ == "__main__":
    key = jax.random.PRNGKey(0)
    kh, kx, kp = jax.random.split(key, 3)

    N, H, F = 2048, 32, 64            # nodes, hidden dim, node-feature dim
    h = jax.random.normal(kh, (N, H), jnp.float32)   # node embeddings
    x = jax.random.normal(kx, (N, F), jnp.float32)   # node features (targets)
    params = init_params(H, F, kp)

    out_train = node_feat_reconstruction(h, x, params, inference=False)
    out_infer = node_feat_reconstruction(h, x, params, inference=True)
    jax.block_until_ready(out_train["loss"])
    jax.block_until_ready(out_infer["loss"])

    # Tight check vs a reference following the same bf16-matmul dtype path.
    ref_pn = _reference_losses(h, x, params)
    assert out_infer["loss"].shape == (N,)
    assert jnp.allclose(out_infer["loss"], ref_pn, rtol=1e-2, atol=1e-2)
    assert jnp.allclose(out_train["loss"], jnp.mean(ref_pn), rtol=1e-2, atol=1e-2)

    # Loose check vs pure-f32 module semantics (bf16 MXU operands perturb the
    # loss only at the ~1e-3 level for these magnitudes).
    w1, b1, w2, b2 = params
    x_hat32 = jnp.maximum(h @ w1 + b1, 0.0) @ w2 + b2
    ref32 = jnp.mean((x_hat32 - x) ** 2, axis=-1)
    assert jnp.allclose(out_infer["loss"], ref32, rtol=5e-2, atol=5e-2)
    assert jnp.allclose(out_train["loss"], jnp.mean(ref32), rtol=5e-2, atol=5e-2)

    # Ragged node count (exercises the in-kernel tail masking, no padding pass).
    N2 = 1000
    h2 = jax.random.normal(kh, (N2, H), jnp.float32)
    x2 = jax.random.normal(kx, (N2, F), jnp.float32)
    out2_i = node_feat_reconstruction(h2, x2, params, inference=True)
    out2_t = node_feat_reconstruction(h2, x2, params, inference=False)
    jax.block_until_ready(out2_i["loss"])
    jax.block_until_ready(out2_t["loss"])
    ref2 = _reference_losses(h2, x2, params)
    assert out2_i["loss"].shape == (N2,)
    assert jnp.allclose(out2_i["loss"], ref2, rtol=1e-2, atol=1e-2)
    assert jnp.allclose(out2_t["loss"], jnp.mean(ref2), rtol=1e-2, atol=1e-2)

    print("KERNEL_OK")
</pallas_src>

<mosaic_0001>
module attributes {stable_mosaic.version = 11 : i64} {
  func.func @_partial_sum_kernel(%arg0: i32, %arg1: memref<512x32xf32, #tpu.memory_space<vmem>>, %arg2: memref<512x64xf32, #tpu.memory_space<vmem>>, %arg3: memref<32x32xbf16, #tpu.memory_space<vmem>>, %arg4: memref<1x32xf32, #tpu.memory_space<vmem>>, %arg5: memref<32x64xbf16, #tpu.memory_space<vmem>>, %arg6: memref<1x64xf32, #tpu.memory_space<vmem>>, %arg7: memref<8x512xbf16, #tpu.memory_space<vmem>>, %arg8: memref<1x1x64xf32, #tpu.memory_space<vmem>>) attributes {dimension_semantics = [#tpu.dimension_semantics<parallel>], iteration_bounds = array<i64: 4>, scalar_prefetch = 0 : i64, scratch_operands = 0 : i64, tpu.core_type = #tpu.core_type<tc>, window_params = [{transform_indices = @transform_0, window_bounds = array<i64: 512, 32>}, {transform_indices = @transform_1, window_bounds = array<i64: 512, 64>}, {pipeline_mode = #tpu.pipeline_mode<synchronous>, transform_indices = @transform_2, window_bounds = array<i64: 32, 32>}, {pipeline_mode = #tpu.pipeline_mode<synchronous>, transform_indices = @transform_3, window_bounds = array<i64: 1, 32>}, {pipeline_mode = #tpu.pipeline_mode<synchronous>, transform_indices = @transform_4, window_bounds = array<i64: 32, 64>}, {pipeline_mode = #tpu.pipeline_mode<synchronous>, transform_indices = @transform_5, window_bounds = array<i64: 1, 64>}, {pipeline_mode = #tpu.pipeline_mode<synchronous>, transform_indices = @transform_6, window_bounds = array<i64: 8, 512>}, {transform_indices = @transform_7, window_bounds = array<i64: 1, 1, 64>}]} {
    %c0 = arith.constant 0 : index
    %c0_0 = arith.constant 0 : index
    %0 = vector.load %arg1[%c0, %c0_0] : memref<512x32xf32, #tpu.memory_space<vmem>>, vector<512x32xf32>
    %1 = arith.truncf %0 : vector<512x32xf32> to vector<512x32xbf16>
    %c0_1 = arith.constant 0 : index
    %c0_2 = arith.constant 0 : index
    %2 = vector.load %arg3[%c0_1, %c0_2] : memref<32x32xbf16, #tpu.memory_space<vmem>>, vector<32x32xbf16>
    %cst = arith.constant dense<0.000000e+00> : vector<512x32xf32>
    %3 = tpu.matmul %1, %2, %cst {dimension_numbers = #tpu.dot_dimension_numbers<[1], [0], [0], [1], [0, 0, 1, 1], [], []>} : vector<512x32xbf16>, vector<32x32xbf16>, vector<512x32xf32> -> vector<512x32xf32>
    %c0_3 = arith.constant 0 : index
    %c0_4 = arith.constant 0 : index
    %4 = vector.load %arg4[%c0_3, %c0_4] : memref<1x32xf32, #tpu.memory_space<vmem>>, vector<1x32xf32>
    %5 = vector.broadcast %4 : vector<1x32xf32> to vector<512x32xf32>
    %6 = arith.addf %3, %5 : vector<512x32xf32>
    %cst_5 = arith.constant 0.000000e+00 : f32
    %7 = vector.broadcast %cst_5 : f32 to vector<512x32xf32>
    %8 = arith.maximumf %6, %7 : vector<512x32xf32>
    %9 = arith.truncf %8 : vector<512x32xf32> to vector<512x32xbf16>
    %c0_6 = arith.constant 0 : index
    %c0_7 = arith.constant 0 : index
    %10 = vector.load %arg5[%c0_6, %c0_7] : memref<32x64xbf16, #tpu.memory_space<vmem>>, vector<32x64xbf16>
    %cst_8 = arith.constant dense<0.000000e+00> : vector<512x64xf32>
    %11 = tpu.matmul %9, %10, %cst_8 {dimension_numbers = #tpu.dot_dimension_numbers<[1], [0], [0], [1], [0, 0, 1, 1], [], []>} : vector<512x32xbf16>, vector<32x64xbf16>, vector<512x64xf32> -> vector<512x64xf32>
    %c0_9 = arith.constant 0 : index
    %c0_10 = arith.constant 0 : index
    %12 = vector.load %arg6[%c0_9, %c0_10] : memref<1x64xf32, #tpu.memory_space<vmem>>, vector<1x64xf32>
    %13 = vector.broadcast %12 : vector<1x64xf32> to vector<512x64xf32>
    %14 = arith.addf %11, %13 : vector<512x64xf32>
    %c0_11 = arith.constant 0 : index
    %c0_12 = arith.constant 0 : index
    %15 = vector.load %arg2[%c0_11, %c0_12] : memref<512x64xf32, #tpu.memory_space<vmem>>, vector<512x64xf32>
    %16 = arith.subf %14, %15 : vector<512x64xf32>
    %17 = arith.mulf %16, %16 : vector<512x64xf32>
    %c0_13 = arith.constant 0 : index
    %c0_14 = arith.constant 0 : index
    %18 = vector.load %arg7[%c0_13, %c0_14] : memref<8x512xbf16, #tpu.memory_space<vmem>>, vector<8x512xbf16>
    %19 = arith.truncf %17 : vector<512x64xf32> to vector<512x64xbf16>
    %cst_15 = arith.constant dense<0.000000e+00> : vector<8x64xf32>
    %20 = tpu.matmul %18, %19, %cst_15 {dimension_numbers = #tpu.dot_dimension_numbers<[1], [0], [0], [1], [0, 0, 1, 1], [], []>} : vector<8x512xbf16>, vector<512x64xbf16>, vector<8x64xf32> -> vector<8x64xf32>
    %21 = vector.extract_strided_slice %20 {offsets = [0, 0], sizes = [1, 64], strides = [1, 1]} : vector<8x64xf32> to vector<1x64xf32>
    %22 = vector.shape_cast %21 : vector<1x64xf32> to vector<1x1x64xf32>
    %c0_16 = arith.constant 0 : index
    %c0_17 = arith.constant 0 : index
    %c0_18 = arith.constant 0 : index
    %23 = vector.load %arg8[%c0_16, %c0_17, %c0_18] : memref<1x1x64xf32, #tpu.memory_space<vmem>>, vector<1x1x64xf32>
    tpu.vector_store %arg8[%c0_16, %c0_17, %c0_18], %22 {strides = array<i32>} : memref<1x1x64xf32, #tpu.memory_space<vmem>>, vector<1x1x64xf32>,
    return
  }
  func.func @transform_0(%arg0: i32) -> (i32, i32) {
    %c0_i32 = arith.constant 0 : i32
    %c0_i32_0 = arith.constant 0 : i32
    return %arg0, %c0_i32 : i32, i32
  }
  func.func @transform_1(%arg0: i32) -> (i32, i32) {
    %c0_i32 = arith.constant 0 : i32
    %c0_i32_0 = arith.constant 0 : i32
    return %arg0, %c0_i32 : i32, i32
  }
  func.func @transform_2(%arg0: i32) -> (i32, i32) {
    %c0_i32 = arith.constant 0 : i32
    %c0_i32_0 = arith.constant 0 : i32
    %c0_i32_1 = arith.constant 0 : i32
    return %c0_i32, %c0_i32_0 : i32, i32
  }
  func.func @transform_3(%arg0: i32) -> (i32, i32) {
    %c0_i32 = arith.constant 0 : i32
    %c0_i32_0 = arith.constant 0 : i32
    %c0_i32_1 = arith.constant 0 : i32
    return %c0_i32, %c0_i32_0 : i32, i32
  }
  func.func @transform_4(%arg0: i32) -> (i32, i32) {
    %c0_i32 = arith.constant 0 : i32
    %c0_i32_0 = arith.constant 0 : i32
    %c0_i32_1 = arith.constant 0 : i32
    return %c0_i32, %c0_i32_0 : i32, i32
  }
  func.func @transform_5(%arg0: i32) -> (i32, i32) {
    %c0_i32 = arith.constant 0 : i32
    %c0_i32_0 = arith.constant 0 : i32
    %c0_i32_1 = arith.constant 0 : i32
    return %c0_i32, %c0_i32_0 : i32, i32
  }
  func.func @transform_6(%arg0: i32) -> (i32, i32) {
    %c0_i32 = arith.constant 0 : i32
    %c0_i32_0 = arith.constant 0 : i32
    %c0_i32_1 = arith.constant 0 : i32
    return %c0_i32, %c0_i32_0 : i32, i32
  }
  func.func @transform_7(%arg0: i32) -> (i32, i32, i32) {
    %c0_i32 = arith.constant 0 : i32
    %c0_i32_0 = arith.constant 0 : i32
    %c0_i32_1 = arith.constant 0 : i32
    return %arg0, %c0_i32, %c0_i32_0 : i32, i32, i32
  }
}

</mosaic_0001>

<bundles_post_ra>
// kernel: node_feat_reconstruction.1
= control target key start
LH: loop header
LB: loop body
LE: loop exit
PB: predicated region body
PF: predicated region fallthrough
CT: control target
= control target key end

     0   :  { %s2087_s24 = smov 0   ;;  %s2627_s0 = inlined_call_operand.vmem [shape: f32[2048,32], index: 0, kind: input, shape index: {}]   ;;  %s2628_s1 = inlined_call_operand.vmem [shape: f32[2048,64], index: 1, kind: input, shape index: {}]   ;;  %s2629_s2 = inlined_call_operand.vmem [shape: bf16[32,32], index: 2, kind: input, shape index: {}]   ;;  %s2630_s3 = inlined_call_operand.vmem [shape: f32[1,32], index: 3, kind: input, shape index: {}]   ;;  %s2631_s4 = inlined_call_operand.vmem [shape: bf16[32,64], index: 4, kind: input, shape index: {}]   ;;  %s2632_s5 = inlined_call_operand.vmem [shape: f32[1,64], index: 5, kind: input, shape index: {}]   ;;  %s2633_s6 = inlined_call_operand.vmem [shape: bf16[8,512], index: 6, kind: input, shape index: {}]   ;;  %s2634_s7 = inlined_call_operand.vmem [shape: f32[4,1,64], index: 7, kind: output, shape index: {}]  }
   0x1 LB: > { %s2093_s25 = sadd.s32 4294967295, %s2045_s24   ;;  %p1694_p0 = scmp.ge.s32.totalorder %s2045_s24, 1  ;;  %s2045_s24 = sphi %s2087_s24, %s17_s24  }
   0x2   : > { %p249_p1 = scmp.lt.s32.totalorder %s2045_s24, 5 }
   0x4   : > { %p250_p2 = pnand %p1694_p0, %p249_p1 }
   0x5   : > { %v2031_v0 = vld [vmem:[%s2629_s2] sm:$0xff] (!%p250_p2)   ;;  %s1695_s28 = sshll.u32 (!%p250_p2), %s2093_s25, 6  ;;  %v2032_v1 = vld [vmem:[%s2629_s2 + $0x8] sm:$0xff] (!%p250_p2)   ;;  %vm419_vm0 = vcmask (!%p250_p2), 261120   ;;  %p296_p4 = scmp.lt.s32.totalorder (!%p250_p2), %s2093_s25, 3  ;;  %vm1629_vm1 = vcmask (!%p250_p2), 516096  }
   0x6   : > { %253 = sbr.rel (%p250_p2) target bundleno = 811 (0x32b), region = 48  ;;  %p285_p3 = scmp.lt.s32.totalorder (!%p250_p2), %s1695_s28, 255  ;;  %1887 = vmatprep.subr.bf16.mxu0 (!%p250_p2), %v2031_v0 }
   0x7   : > { %1888 = vmatpush3.bf16.msra.mxu0 (!%p250_p2), %v2031_v0 }
   0x8   : > { %1889 = vmatprep.subr.bf16.mxu0 (!%p250_p2), %v2032_v1 }
   0xb   : > { %1890 = vmatpush3.bf16.msra.mxu0 (!%p250_p2), %v2032_v1 }
   0xd   : > { %s2636_s28 = smov (!%p285_p3, %s1695_s28), 255  ;;  %s2638_s25 = smov (!%p296_p4, %s2093_s25), 3 }
   0xe   : > { %s1696_s8 = sshll.u32 %s2636_s28, 3 }
   0xf   : > { %s2112_s11 = scalar_lea.vmem %s2627_s0, %s1696_s8  ;;  %s2322_s20 = scalar_lea.vmem %s2628_s1, %s1696_s8 }
  0x10   : > { %v300_v2 = vld [vmem:[%s2112_s11] sm:$0xff]  ;;  %v301_v3 = vld [vmem:[%s2112_s11 + $0x8] sm:$0xff]  ;;  %v302_v4 = vld [vmem:[%s2112_s11 + $0x10] sm:$0xff]  ;;  %s298_s8 = scalar_lea.vmem %s2634_s7, %s2638_s25 }
  0x11   : > { %v364_v5 = vpack.c.bf16 %v301_v3, %v300_v2  ;;  %v303_v6 = vld [vmem:[%s2112_s11 + $0x18] sm:$0xff]  ;;  %v304_v7 = vld [vmem:[%s2112_s11 + $0x20] sm:$0xff]  ;;  %v305_v8 = vld [vmem:[%s2112_s11 + $0x28] sm:$0xff] }
  0x12   : > { %v365_v9 = vpack.c.bf16 %v303_v6, %v302_v4  ;;  %v366_v10 = vpack.c.bf16 %v305_v8, %v304_v7  ;;  %v306_v11 = vld [vmem:[%s2112_s11 + $0x30] sm:$0xff]  ;;  %v307_v12 = vld [vmem:[%s2112_s11 + $0x38] sm:$0xff]  ;;  %v308_v13 = vld [vmem:[%s2112_s11 + $0x40] sm:$0xff] }
  0x13   : > { %1891 = vmatprep.mubr.msk.bf16.mxu0 %vm419_vm0, %v364_v5  ;;  %v309_v14 = vld [vmem:[%s2112_s11 + $0x48] sm:$0xff]  ;;  %v367_v15 = vpack.c.bf16 %v307_v12, %v306_v11  ;;  %v310_v17 = vld [vmem:[%s2112_s11 + $0x50] sm:$0xff]  ;;  %v311_v18 = vld [vmem:[%s2112_s11 + $0x58] sm:$0xff] }
  0x14   : > { %1892 = vmatmul.mubr.msk.bf16.vlgmr.msra.gmra.mrb[0].mxu0 %vm419_vm0, %v365_v9  ;;  %v368_v16 = vpack.c.bf16 %v309_v14, %v308_v13  ;;  %v312_v19 = vld [vmem:[%s2112_s11 + $0x60] sm:$0xff]  ;;  %v313_v20 = vld [vmem:[%s2112_s11 + $0x68] sm:$0xff]  ;;  %v369_v21 = vpack.c.bf16 %v311_v18, %v310_v17  ;;  %v314_v23 = vld [vmem:[%s2112_s11 + $0x70] sm:$0xff] }
  0x15   : > { %1895 = vmatprep.mubr.msk.bf16.mxu0 %vm419_vm0, %v366_v10  ;;  %v370_v22 = vpack.c.bf16 %v313_v20, %v312_v19  ;;  %v315_v24 = vld [vmem:[%s2112_s11 + $0x78] sm:$0xff]  ;;  %v316_v25 = vld [vmem:[%s2112_s11 + $0x80] sm:$0xff]  ;;  %v317_v26 = vld [vmem:[%s2112_s11 + $0x88] sm:$0xff] }
  0x16   : > { %v371_v27 = vpack.c.bf16 %v315_v24, %v314_v23  ;;  %v372_v28 = vpack.c.bf16 %v317_v26, %v316_v25  ;;  %v318_v29 = vld [vmem:[%s2112_s11 + $0x90] sm:$0xff]  ;;  %v319_v30 = vld [vmem:[%s2112_s11 + $0x98] sm:$0xff]  ;;  %v320_v31 = vld [vmem:[%s2112_s11 + $0xa0] sm:$0xff] }
  0x17   : > { %v321_v32 = vld [vmem:[%s2112_s11 + $0xa8] sm:$0xff]  ;;  %v373_v33 = vpack.c.bf16 %v319_v30, %v318_v29  ;;  %v322_v35 = vld [vmem:[%s2112_s11 + $0xb0] sm:$0xff]  ;;  %v323_v36 = vld [vmem:[%s2112_s11 + $0xb8] sm:$0xff] }
  0x18   : > { %v374_v34 = vpack.c.bf16 %v321_v32, %v320_v31  ;;  %v324_v37 = vld [vmem:[%s2112_s11 + $0xc0] sm:$0xff]  ;;  %v325_v38 = vld [vmem:[%s2112_s11 + $0xc8] sm:$0xff]  ;;  %v375_v39 = vpack.c.bf16 %v323_v36, %v322_v35  ;;  %v326_v41 = vld [vmem:[%s2112_s11 + $0xd0] sm:$0xff] }
  0x19   : > { %v376_v40 = vpack.c.bf16 %v325_v38, %v324_v37  ;;  %v327_v42 = vld [vmem:[%s2112_s11 + $0xd8] sm:$0xff]  ;;  %v328_v43 = vld [vmem:[%s2112_s11 + $0xe0] sm:$0xff]  ;;  %v329_v44 = vld [vmem:[%s2112_s11 + $0xe8] sm:$0xff] }
  0x1a   : > { %v377_v45 = vpack.c.bf16 %v327_v42, %v326_v41  ;;  %v378_v46 = vpack.c.bf16 %v329_v44, %v328_v43  ;;  %v330_v47 = vld [vmem:[%s2112_s11 + $0xf0] sm:$0xff]  ;;  %v331_v48 = vld [vmem:[%s2112_s11 + $0xf8] sm:$0xff]  ;;  %v332_v49 = vld [vmem:[%s2112_s11 + $0x100] sm:$0xff] }
  0x1b   : > { %v333_v50 = vld [vmem:[%s2112_s11 + $0x108] sm:$0xff]  ;;  %v379_v51 = vpack.c.bf16 %v331_v48, %v330_v47  ;;  %v334_v53 = vld [vmem:[%s2112_s11 + $0x110] sm:$0xff]  ;;  %v335_v54 = vld [vmem:[%s2112_s11 + $0x118] sm:$0xff] }
  0x1c   : > { %1896 = vmatmul.mubr.msk.bf16.gmra.mrb[4].mxu0 %vm419_vm0, %v367_v15  ;;  %v380_v52 = vpack.c.bf16 %v333_v50, %v332_v49  ;;  %v336_v55 = vld [vmem:[%s2112_s11 + $0x120] sm:$0xff]  ;;  %v337_v56 = vld [vmem:[%s2112_s11 + $0x128] sm:$0xff]  ;;  %v381_v57 = vpack.c.bf16 %v335_v54, %v334_v53  ;;  %v338_v59 = vld [vmem:[%s2112_s11 + $0x130] sm:$0xff] }
  0x1d   : > { %1899 = vmatprep.mubr.msk.bf16.mxu0 %vm419_vm0, %v368_v16  ;;  %v382_v58 = vpack.c.bf16 %v337_v56, %v336_v55  ;;  %v339_v60 = vld [vmem:[%s2112_s11 + $0x138] sm:$0xff]  ;;  %v340_v61 = vld [vmem:[%s2112_s11 + $0x140] sm:$0xff]  ;;  %v341_v62 = vld [vmem:[%s2112_s11 + $0x148] sm:$0xff] }
  0x1e   : > { %v383_v63 = vpack.c.bf16 %v339_v60, %v338_v59  ;;  %v384_v0 = vpack.c.bf16 %v341_v62, %v340_v61  ;;  %v342_v1 = vld [vmem:[%s2112_s11 + $0x150] sm:$0xff]  ;;  %v343_v2 = vld [vmem:[%s2112_s11 + $0x158] sm:$0xff]  ;;  %v344_v3 = vld [vmem:[%s2112_s11 + $0x160] sm:$0xff] }
  0x1f   : > { %v345_v4 = vld [vmem:[%s2112_s11 + $0x168] sm:$0xff]  ;;  %v385_v5 = vpack.c.bf16 %v343_v2, %v342_v1  ;;  %v346_v7 = vld [vmem:[%s2112_s11 + $0x170] sm:$0xff]  ;;  %v347_v8 = vld [vmem:[%s2112_s11 + $0x178] sm:$0xff] }
  0x20   : > { %v386_v6 = vpack.c.bf16 %v345_v4, %v344_v3  ;;  %v348_v9 = vld [vmem:[%s2112_s11 + $0x180] sm:$0xff]  ;;  %v349_v10 = vld [vmem:[%s2112_s11 + $0x188] sm:$0xff]  ;;  %v387_v11 = vpack.c.bf16 %v347_v8, %v346_v7  ;;  %v350_v15 = vld [vmem:[%s2112_s11 + $0x190] sm:$0xff] }
  0x21   : > { %v2033_v12 = vld [vmem:[%s2631_s4] sm:$0xff]   ;;  %v388_v13 = vpack.c.bf16 %v349_v10, %v348_v9  ;;  %v2034_v14 = vld [vmem:[%s2631_s4 + $0x8] sm:$0xff]   ;;  %v351_v16 = vld [vmem:[%s2112_s11 + $0x198] sm:$0xff] }
  0x22   : > { %1955 = vmatprep.subr.bf16.mxu1 %v2033_v12  ;;  %v352_v17 = vld [vmem:[%s2112_s11 + $0x1a0] sm:$0xff]  ;;  %v353_v18 = vld [vmem:[%s2112_s11 + $0x1a8] sm:$0xff]  ;;  %v389_v19 = vpack.c.bf16 %v351_v16, %v350_v15 }
  0x23   : > { %1956 = vmatpush3.bf16.msra.mxu1 %v2033_v12  ;;  %v390_v20 = vpack.c.bf16 %v353_v18, %v352_v17  ;;  %v356_v23 = vld [vmem:[%s2112_s11 + $0x1c0] sm:$0xff]  ;;  %v357_v24 = vld [vmem:[%s2112_s11 + $0x1c8] sm:$0xff] }
  0x24   : > { %1900 = vmatmul.mubr.msk.bf16.gmra.mrb[8].mxu0 %vm419_vm0, %v369_v21  ;;  %1957 = vmatprep.subr.bf16.mxu1 %v2034_v14  ;;  %v354_v21 = vld [vmem:[%s2112_s11 + $0x1b0] sm:$0xff]  ;;  %v392_v26 = vpack.c.bf16 %v357_v24, %v356_v23  ;;  %v360_v29 = vld [vmem:[%s2112_s11 + $0x1e0] sm:$0xff]  ;;  %v361_v30 = vld [vmem:[%s2112_s11 + $0x1e8] sm:$0xff] }
  0x25   : > { %1903 = vmatprep.mubr.msk.bf16.mxu0 %vm419_vm0, %v370_v22  ;;  %v355_v22 = vld [vmem:[%s2112_s11 + $0x1b8] sm:$0xff]  ;;  %v394_v32 = vpack.c.bf16 %v361_v30, %v360_v29  ;;  %v2219_v36 = vld [vmem:[%s2630_s3] ss:$0 sm:$0xff] }
  0x26   : > { %v391_v25 = vpack.c.bf16 %v355_v22, %v354_v21 }
  0x27   : > { %1958 = vmatpush3.bf16.msra.mxu1 %v2034_v14 }
  0x2c   : > { %1904 = vmatmul.mubr.msk.bf16.gmra.mrb[12].mxu0 %vm419_vm0, %v371_v27  ;;  %v358_v27 = vld [vmem:[%s2112_s11 + $0x1d0] sm:$0xff] }
  0x2d   : > { %1907 = vmatprep.mubr.msk.bf16.mxu0 %vm419_vm0, %v372_v28  ;;  %v359_v28 = vld [vmem:[%s2112_s11 + $0x1d8] sm:$0xff] }
  0x2e   : > { %v393_v31 = vpack.c.bf16 %v359_v28, %v358_v27 }
  0x34   : > { %1908 = vmatmul.mubr.msk.bf16.gmra.mrb[16].mxu0 %vm419_vm0, %v373_v33  ;;  %v362_v33 = vld [vmem:[%s2112_s11 + $0x1f0] sm:$0xff] }
  0x35   : > { %1911 = vmatprep.mubr.msk.bf16.mxu0 %vm419_vm0, %v374_v34  ;;  %v363_v34 = vld [vmem:[%s2112_s11 + $0x1f8] sm:$0xff] }
  0x36   : > { %v395_v35 = vpack.c.bf16 %v363_v34, %v362_v33 }
  0x3c   : > { %1912 = vmatmul.mubr.msk.bf16.gmra.mrb[20].mxu0 %vm419_vm0, %v375_v39 }
  0x3d   : > { %1915 = vmatprep.mubr.msk.bf16.mxu0 %vm419_vm0, %v376_v40 }
  0x44   : > { %1916 = vmatmul.mubr.msk.bf16.gmra.mrb[24].mxu0 %vm419_vm0, %v377_v45 }
  0x45   : > { %1919 = vmatprep.mubr.msk.bf16.mxu0 %vm419_vm0, %v378_v46 }
  0x4c   : > { %1920 = vmatmul.mubr.msk.bf16.gmra.mrb[28].mxu0 %vm419_vm0, %v379_v51 }
  0x4d   : > { %1923 = vmatprep.mubr.msk.bf16.mxu0 %vm419_vm0, %v380_v52 }
  0x54   : > { %1924 = vmatmul.mubr.msk.bf16.gmra.mrb[32].mxu0 %vm419_vm0, %v381_v57 }
  0x55   : > { %1927 = vmatprep.mubr.msk.bf16.mxu0 %vm419_vm0, %v382_v58 }
  0x5c   : > { %1928 = vmatmul.mubr.msk.bf16.gmra.mrb[36].mxu0 %vm419_vm0, %v383_v63 }
  0x5d   : > { %1931 = vmatprep.mubr.msk.bf16.mxu0 %vm419_vm0, %v384_v0 }
  0x64   : > { %1932 = vmatmul.mubr.msk.bf16.gmra.mrb[40].mxu0 %vm419_vm0, %v385_v5 }
  0x65   : > { %1935 = vmatprep.mubr.msk.bf16.mxu0 %vm419_vm0, %v386_v6 }
  0x6c   : > { %1936 = vmatmul.mubr.msk.bf16.gmra.mrb[44].mxu0 %vm419_vm0, %v387_v11 }
  0x6d   : > { %1939 = vmatprep.mubr.msk.bf16.mxu0 %vm419_vm0, %v388_v13 }
  0x74   : > { %1940 = vmatmul.mubr.msk.bf16.gmra.mrb[48].mxu0 %vm419_vm0, %v389_v19 }
  0x75   : > { %1943 = vmatprep.mubr.msk.bf16.mxu0 %vm419_vm0, %v390_v20 }
  0x7c   : > { %1944 = vmatmul.mubr.msk.bf16.gmra.mrb[52].mxu0 %vm419_vm0, %v391_v25 }
  0x7d   : > { %1947 = vmatprep.mubr.msk.bf16.mxu0 %vm419_vm0, %v392_v26 }
  0x84   : > { %1948 = vmatmul.mubr.msk.bf16.gmra.mrb[56].mxu0 %vm419_vm0, %v393_v31 }
  0x85   : > { %1951 = vmatprep.mubr.msk.bf16.mxu0 %vm419_vm0, %v394_v32 }
  0x8c   : > { %1952 = vmatmul.mubr.msk.bf16.gmra.mrb[60].mxu0 %vm419_vm0, %v395_v35 }
  0xe7   : > { %v1893_v37 = vpop.f32.mrb[0].mxu0 }
  0xe8   : > { %v559_v38 = vadd.f32 %v1893_v37, %v2219_v36  ;;  %v550_v39 = vpop.f32.mrb[1].mxu0 }
  0xe9   : > { %v551_v40 = vadd.f32 %v2219_v36, %v550_v39  ;;  %v1894_v41 = vpop.f32.mrb[2].mxu0 }
  0xea   : > { %v562_v42 = vadd.f32 %v1894_v41, %v2219_v36  ;;  %v553_v43 = vpop.f32.mrb[3].mxu0  ;;  %v807_v45 = vmax.f32 %v559_v38, 0.0 }
  0xeb   : > { %v554_v44 = vadd.f32 %v2219_v36, %v553_v43  ;;  %v805_v47 = vmax.f32 %v551_v40, 0.0 }
  0xec   : > { %v808_v46 = vmax.f32 %v562_v42, 0.0 }
  0xed   : > { %v806_v48 = vmax.f32 %v554_v44, 0.0 }
  0xee   : > { %v870_v49 = vpack.c.bf16 %v808_v46, %v807_v45 }
  0xef   : > { %v1897_v50 = vpop.f32.mrb[4].mxu0  ;;  %v869_v51 = vpack.c.bf16 %v806_v48, %v805_v47 }
  0xf0   : > { %v575_v52 = vadd.f32 %v1897_v50, %v2219_v36  ;;  %v566_v53 = vpop.f32.mrb[5].mxu0 }
  0xf1   : > { %v567_v54 = vadd.f32 %v2219_v36, %v566_v53  ;;  %v1898_v55 = vpop.f32.mrb[6].mxu0  ;;  %1959 = vmatprep.mubr.msk.bf16.mxu1 %vm419_vm0, %v869_v51 }
  0xf2   : > { %v578_v56 = vadd.f32 %v1898_v55, %v2219_v36  ;;  %v569_v57 = vpop.f32.mrb[7].mxu0  ;;  %1960 = vmatmul.mubr.msk.bf16.vlgmr.msra.gmra.mrb[0].mxu1 %vm419_vm0, %v870_v49  ;;  %v811_v59 = vmax.f32 %v575_v52, 0.0 }
  0xf3   : > { %v570_v58 = vadd.f32 %v2219_v36, %v569_v57  ;;  %v809_v61 = vmax.f32 %v567_v54, 0.0 }
  0xf4   : > { %v812_v60 = vmax.f32 %v578_v56, 0.0 }
  0xf5   : > { %v810_v62 = vmax.f32 %v570_v58, 0.0 }
  0xf6   : > { %v872_v63 = vpack.c.bf16 %v812_v60, %v811_v59 }
  0xf7   : > { %v871_v0 = vpack.c.bf16 %v810_v62, %v809_v61  ;;  %v1901_v1 = vpop.f32.mrb[8].mxu0 }
  0xf8   : > { %v591_v2 = vadd.f32 %v1901_v1, %v2219_v36  ;;  %v582_v3 = vpop.f32.mrb[9].mxu0 }
  0xf9   : > { %v583_v4 = vadd.f32 %v2219_v36, %v582_v3  ;;  %v1902_v5 = vpop.f32.mrb[10].mxu0  ;;  %1963 = vmatprep.mubr.msk.bf16.mxu1 %vm419_vm0, %v871_v0 }
  0xfa   : > { %v594_v6 = vadd.f32 %v1902_v5, %v2219_v36  ;;  %v585_v7 = vpop.f32.mrb[11].mxu0  ;;  %1964 = vmatmul.mubr.msk.bf16.gmra.mrb[4].mxu1 %vm419_vm0, %v872_v63  ;;  %v815_v9 = vmax.f32 %v591_v2, 0.0 }
  0xfb   : > { %v586_v8 = vadd.f32 %v2219_v36, %v585_v7  ;;  %v813_v11 = vmax.f32 %v583_v4, 0.0 }
  0xfc   : > { %v816_v10 = vmax.f32 %v594_v6, 0.0 }
  0xfd   : > { %v814_v12 = vmax.f32 %v586_v8, 0.0 }
  0xfe   : > { %v874_v13 = vpack.c.bf16 %v816_v10, %v815_v9 }
  0xff   : > { %v873_v14 = vpack.c.bf16 %v814_v12, %v813_v11  ;;  %v1905_v15 = vpop.f32.mrb[12].mxu0 }
 0x100   : > { %v607_v16 = vadd.f32 %v1905_v15, %v2219_v36  ;;  %v598_v17 = vpop.f32.mrb[13].mxu0 }
 0x101   : > { %v599_v18 = vadd.f32 %v2219_v36, %v598_v17  ;;  %v1906_v19 = vpop.f32.mrb[14].mxu0  ;;  %1967 = vmatprep.mubr.msk.bf16.mxu1 %vm419_vm0, %v873_v14 }
 0x102   : > { %v610_v20 = vadd.f32 %v1906_v19, %v2219_v36  ;;  %v601_v21 = vpop.f32.mrb[15].mxu0  ;;  %1968 = vmatmul.mubr.msk.bf16.gmra.mrb[8].mxu1 %vm419_vm0, %v874_v13  ;;  %v819_v23 = vmax.f32 %v607_v16, 0.0 }
 0x103   : > { %v602_v22 = vadd.f32 %v2219_v36, %v601_v21  ;;  %v817_v25 = vmax.f32 %v599_v18, 0.0 }
 0x104   : > { %v820_v24 = vmax.f32 %v610_v20, 0.0 }
 0x105   : > { %v818_v26 = vmax.f32 %v602_v22, 0.0 }
 0x106   : > { %v876_v27 = vpack.c.bf16 %v820_v24, %v819_v23 }
 0x107   : > { %v875_v28 = vpack.c.bf16 %v818_v26, %v817_v25  ;;  %v1909_v29 = vpop.f32.mrb[16].mxu0 }
 0x108   : > { %v623_v30 = vadd.f32 %v1909_v29, %v2219_v36  ;;  %v614_v31 = vpop.f32.mrb[17].mxu0 }
 0x109   : > { %v615_v32 = vadd.f32 %v2219_v36, %v614_v31  ;;  %v1910_v33 = vpop.f32.mrb[18].mxu0  ;;  %1971 = vmatprep.mubr.msk.bf16.mxu1 %vm419_vm0, %v875_v28 }
 0x10a   : > { %v626_v34 = vadd.f32 %v1910_v33, %v2219_v36  ;;  %v617_v35 = vpop.f32.mrb[19].mxu0  ;;  %1972 = vmatmul.mubr.msk.bf16.gmra.mrb[12].mxu1 %vm419_vm0, %v876_v27  ;;  %v823_v38 = vmax.f32 %v623_v30, 0.0 }
 0x10b   : > { %v618_v37 = vadd.f32 %v2219_v36, %v617_v35  ;;  %v821_v40 = vmax.f32 %v615_v32, 0.0 }
 0x10c   : > { %v824_v39 = vmax.f32 %v626_v34, 0.0 }
 0x10d   : > { %v822_v41 = vmax.f32 %v618_v37, 0.0 }
 0x10e   : > { %v878_v42 = vpack.c.bf16 %v824_v39, %v823_v38 }
 0x10f   : > { %v877_v43 = vpack.c.bf16 %v822_v41, %v821_v40  ;;  %v1913_v44 = vpop.f32.mrb[20].mxu0 }
 0x110   : > { %v639_v45 = vadd.f32 %v1913_v44, %v2219_v36  ;;  %v630_v46 = vpop.f32.mrb[21].mxu0 }
 0x111   : > { %v631_v47 = vadd.f32 %v2219_v36, %v630_v46  ;;  %v1914_v48 = vpop.f32.mrb[22].mxu0  ;;  %1975 = vmatprep.mubr.msk.bf16.mxu1 %vm419_vm0, %v877_v43 }
 0x112   : > { %v642_v49 = vadd.f32 %v1914_v48, %v2219_v36  ;;  %v633_v50 = vpop.f32.mrb[23].mxu0  ;;  %1976 = vmatmul.mubr.msk.bf16.gmra.mrb[16].mxu1 %vm419_vm0, %v878_v42  ;;  %v827_v52 = vmax.f32 %v639_v45, 0.0 }
 0x113   : > { %v634_v51 = vadd.f32 %v2219_v36, %v633_v50  ;;  %v825_v54 = vmax.f32 %v631_v47, 0.0 }
 0x114   : > { %v828_v53 = vmax.f32 %v642_v49, 0.0 }
 0x115   : > { %v826_v55 = vmax.f32 %v634_v51, 0.0 }
 0x116   : > { %v880_v56 = vpack.c.bf16 %v828_v53, %v827_v52 }
 0x117   : > { %v879_v57 = vpack.c.bf16 %v826_v55, %v825_v54  ;;  %v1917_v58 = vpop.f32.mrb[24].mxu0 }
 0x118   : > { %v655_v59 = vadd.f32 %v1917_v58, %v2219_v36  ;;  %v646_v60 = vpop.f32.mrb[25].mxu0 }
 0x119   : > { %v647_v61 = vadd.f32 %v2219_v36, %v646_v60  ;;  %v1918_v62 = vpop.f32.mrb[26].mxu0  ;;  %1979 = vmatprep.mubr.msk.bf16.mxu1 %vm419_vm0, %v879_v57 }
 0x11a   : > { %v658_v63 = vadd.f32 %v1918_v62, %v2219_v36  ;;  %v649_v0 = vpop.f32.mrb[27].mxu0  ;;  %1980 = vmatmul.mubr.msk.bf16.gmra.mrb[20].mxu1 %vm419_vm0, %v880_v56  ;;  %v831_v2 = vmax.f32 %v655_v59, 0.0 }
 0x11b   : > { %v650_v1 = vadd.f32 %v2219_v36, %v649_v0  ;;  %v829_v4 = vmax.f32 %v647_v61, 0.0 }
 0x11c   : > { %v832_v3 = vmax.f32 %v658_v63, 0.0 }
 0x11d   : > { %v830_v5 = vmax.f32 %v650_v1, 0.0 }
 0x11e   : > { %v882_v6 = vpack.c.bf16 %v832_v3, %v831_v2 }
 0x11f   : > { %v881_v7 = vpack.c.bf16 %v830_v5, %v829_v4  ;;  %v1921_v8 = vpop.f32.mrb[28].mxu0 }
 0x120   : > { %v671_v9 = vadd.f32 %v1921_v8, %v2219_v36  ;;  %v662_v10 = vpop.f32.mrb[29].mxu0 }
 0x121   : > { %v663_v11 = vadd.f32 %v2219_v36, %v662_v10  ;;  %v1922_v12 = vpop.f32.mrb[30].mxu0  ;;  %1983 = vmatprep.mubr.msk.bf16.mxu1 %vm419_vm0, %v881_v7 }
 0x122   : > { %v674_v13 = vadd.f32 %v1922_v12, %v2219_v36  ;;  %v665_v14 = vpop.f32.mrb[31].mxu0  ;;  %1984 = vmatmul.mubr.msk.bf16.gmra.mrb[24].mxu1 %vm419_vm0, %v882_v6  ;;  %v835_v16 = vmax.f32 %v671_v9, 0.0 }
 0x123   : > { %v666_v15 = vadd.f32 %v2219_v36, %v665_v14  ;;  %v833_v18 = vmax.f32 %v663_v11, 0.0 }
 0x124   : > { %v836_v17 = vmax.f32 %v674_v13, 0.0 }
 0x125   : > { %v834_v19 = vmax.f32 %v666_v15, 0.0 }
 0x126   : > { %v884_v20 = vpack.c.bf16 %v836_v17, %v835_v16 }
 0x127   : > { %v883_v21 = vpack.c.bf16 %v834_v19, %v833_v18  ;;  %v1925_v22 = vpop.f32.mrb[32].mxu0 }
 0x128   : > { %v687_v23 = vadd.f32 %v1925_v22, %v2219_v36  ;;  %v678_v24 = vpop.f32.mrb[33].mxu0 }
 0x129   : > { %v679_v25 = vadd.f32 %v2219_v36, %v678_v24  ;;  %v1926_v26 = vpop.f32.mrb[34].mxu0  ;;  %1987 = vmatprep.mubr.msk.bf16.mxu1 %vm419_vm0, %v883_v21 }
 0x12a   : > { %v690_v27 = vadd.f32 %v1926_v26, %v2219_v36  ;;  %v681_v28 = vpop.f32.mrb[35].mxu0  ;;  %1988 = vmatmul.mubr.msk.bf16.gmra.mrb[28].mxu1 %vm419_vm0, %v884_v20  ;;  %v839_v30 = vmax.f32 %v687_v23, 0.0 }
 0x12b   : > { %v682_v29 = vadd.f32 %v2219_v36, %v681_v28  ;;  %v837_v32 = vmax.f32 %v679_v25, 0.0 }
 0x12c   : > { %v840_v31 = vmax.f32 %v690_v27, 0.0 }
 0x12d   : > { %v838_v33 = vmax.f32 %v682_v29, 0.0 }
 0x12e   : > { %v886_v34 = vpack.c.bf16 %v840_v31, %v839_v30 }
 0x12f   : > { %v885_v35 = vpack.c.bf16 %v838_v33, %v837_v32  ;;  %v1929_v37 = vpop.f32.mrb[36].mxu0 }
 0x130   : > { %v703_v38 = vadd.f32 %v1929_v37, %v2219_v36  ;;  %v694_v39 = vpop.f32.mrb[37].mxu0 }
 0x131   : > { %v695_v40 = vadd.f32 %v2219_v36, %v694_v39  ;;  %v1930_v41 = vpop.f32.mrb[38].mxu0  ;;  %1991 = vmatprep.mubr.msk.bf16.mxu1 %vm419_vm0, %v885_v35 }
 0x132   : > { %v706_v42 = vadd.f32 %v1930_v41, %v2219_v36  ;;  %v697_v43 = vpop.f32.mrb[39].mxu0  ;;  %1992 = vmatmul.mubr.msk.bf16.gmra.mrb[32].mxu1 %vm419_vm0, %v886_v34  ;;  %v843_v45 = vmax.f32 %v703_v38, 0.0 }
 0x133   : > { %v698_v44 = vadd.f32 %v2219_v36, %v697_v43  ;;  %v841_v47 = vmax.f32 %v695_v40, 0.0 }
 0x134   : > { %v844_v46 = vmax.f32 %v706_v42, 0.0 }
 0x135   : > { %v842_v48 = vmax.f32 %v698_v44, 0.0 }
 0x136   : > { %v888_v49 = vpack.c.bf16 %v844_v46, %v843_v45 }
 0x137   : > { %v887_v50 = vpack.c.bf16 %v842_v48, %v841_v47  ;;  %v1933_v51 = vpop.f32.mrb[40].mxu0 }
 0x138   : > { %v719_v52 = vadd.f32 %v1933_v51, %v2219_v36  ;;  %v710_v53 = vpop.f32.mrb[41].mxu0 }
 0x139   : > { %v711_v54 = vadd.f32 %v2219_v36, %v710_v53  ;;  %v1934_v55 = vpop.f32.mrb[42].mxu0  ;;  %1995 = vmatprep.mubr.msk.bf16.mxu1 %vm419_vm0, %v887_v50 }
 0x13a   : > { %v722_v56 = vadd.f32 %v1934_v55, %v2219_v36  ;;  %v713_v57 = vpop.f32.mrb[43].mxu0  ;;  %1996 = vmatmul.mubr.msk.bf16.gmra.mrb[36].mxu1 %vm419_vm0, %v888_v49  ;;  %v847_v59 = vmax.f32 %v719_v52, 0.0 }
 0x13b   : > { %v714_v58 = vadd.f32 %v2219_v36, %v713_v57  ;;  %v845_v61 = vmax.f32 %v711_v54, 0.0 }
 0x13c   : > { %v848_v60 = vmax.f32 %v722_v56, 0.0 }
 0x13d   : > { %v846_v62 = vmax.f32 %v714_v58, 0.0 }
 0x13e   : > { %v890_v63 = vpack.c.bf16 %v848_v60, %v847_v59 }
 0x13f   : > { %v889_v0 = vpack.c.bf16 %v846_v62, %v845_v61  ;;  %v1937_v1 = vpop.f32.mrb[44].mxu0 }
 0x140   : > { %v735_v2 = vadd.f32 %v1937_v1, %v2219_v36  ;;  %v726_v3 = vpop.f32.mrb[45].mxu0 }
 0x141   : > { %v727_v4 = vadd.f32 %v2219_v36, %v726_v3  ;;  %v1938_v5 = vpop.f32.mrb[46].mxu0  ;;  %1999 = vmatprep.mubr.msk.bf16.mxu1 %vm419_vm0, %v889_v0 }
 0x142   : > { %v738_v6 = vadd.f32 %v1938_v5, %v2219_v36  ;;  %v729_v7 = vpop.f32.mrb[47].mxu0  ;;  %2000 = vmatmul.mubr.msk.bf16.gmra.mrb[40].mxu1 %vm419_vm0, %v890_v63  ;;  %v851_v9 = vmax.f32 %v735_v2, 0.0 }
 0x143   : > { %v730_v8 = vadd.f32 %v2219_v36, %v729_v7  ;;  %v849_v11 = vmax.f32 %v727_v4, 0.0 }
 0x144   : > { %v852_v10 = vmax.f32 %v738_v6, 0.0 }
 0x145   : > { %v850_v12 = vmax.f32 %v730_v8, 0.0 }
 0x146   : > { %v892_v13 = vpack.c.bf16 %v852_v10, %v851_v9  ;;  %v1311_v9 = vld [vmem:[%s2322_s20 + $0x10] sm:$0xff] }
 0x147   : > { %v891_v14 = vpack.c.bf16 %v850_v12, %v849_v11  ;;  %v1941_v15 = vpop.f32.mrb[48].mxu0  ;;  %v1309_v12 = vld [vmem:[%s2322_s20] sm:$0xff] }
 0x148   : > { %v751_v16 = vadd.f32 %v1941_v15, %v2219_v36  ;;  %v742_v17 = vpop.f32.mrb[49].mxu0  ;;  %v1312_v15 = vld [vmem:[%s2322_s20 + $0x18] sm:$0xff] }
 0x149   : > { %v743_v18 = vadd.f32 %v2219_v36, %v742_v17  ;;  %v1942_v19 = vpop.f32.mrb[50].mxu0  ;;  %2003 = vmatprep.mubr.msk.bf16.mxu1 %vm419_vm0, %v891_v14 }
 0x14a   : > { %v754_v20 = vadd.f32 %v1942_v19, %v2219_v36  ;;  %v745_v21 = vpop.f32.mrb[51].mxu0  ;;  %2004 = vmatmul.mubr.msk.bf16.gmra.mrb[44].mxu1 %vm419_vm0, %v892_v13  ;;  %v855_v23 = vmax.f32 %v751_v16, 0.0  ;;  %v1310_v19 = vld [vmem:[%s2322_s20 + $0x8] sm:$0xff] }
 0x14b   : > { %v746_v22 = vadd.f32 %v2219_v36, %v745_v21  ;;  %v853_v25 = vmax.f32 %v743_v18, 0.0 }
 0x14c   : > { %v856_v24 = vmax.f32 %v754_v20, 0.0 }
 0x14d   : > { %v854_v26 = vmax.f32 %v746_v22, 0.0 }
 0x14e   : > { %v894_v27 = vpack.c.bf16 %v856_v24, %v855_v23  ;;  %v2340_v23 = vld [vmem:[%s2633_s6] sm:$0xff] }
 0x14f   : > { %v893_v28 = vpack.c.bf16 %v854_v26, %v853_v25  ;;  %v1945_v29 = vpop.f32.mrb[52].mxu0  ;;  %v1770_v25 = vcombine.high %v2340_v23, %v2340_v23 }
 0x150   : > { %v767_v30 = vadd.f32 %v1945_v29, %v2219_v36  ;;  %v758_v31 = vpop.f32.mrb[53].mxu0 }
 0x151   : > { %v759_v32 = vadd.f32 %v2219_v36, %v758_v31  ;;  %v1946_v33 = vpop.f32.mrb[54].mxu0  ;;  %2007 = vmatprep.mubr.msk.bf16.mxu1 %vm419_vm0, %v893_v28  ;;  %v1315_v31 = vld [vmem:[%s2322_s20 + $0x30] sm:$0xff]  ;;  %1581 = vmatprep.mubr.bf16.mxu0 %v1770_v25 }
 0x152   : > { %v770_v34 = vadd.f32 %v1946_v33, %v2219_v36  ;;  %v761_v35 = vpop.f32.mrb[55].mxu0  ;;  %2008 = vmatmul.mubr.msk.bf16.gmra.mrb[48].mxu1 %vm419_vm0, %v894_v27  ;;  %v859_v38 = vmax.f32 %v767_v30, 0.0 }
 0x153   : > { %v762_v37 = vadd.f32 %v2219_v36, %v761_v35  ;;  %v857_v40 = vmax.f32 %v759_v32, 0.0  ;;  %v2356_v32 = vld [vmem:[%s2633_s6 + $0x8] sm:$0xff] }
 0x154   : > { %v860_v39 = vmax.f32 %v770_v34, 0.0 }
 0x155   : > { %v858_v41 = vmax.f32 %v762_v37, 0.0  ;;  %v1313_v37 = vld [vmem:[%s2322_s20 + $0x20] sm:$0xff] }
 0x156   : > { %v896_v42 = vpack.c.bf16 %v860_v39, %v859_v38  ;;  %v1772_v38 = vcombine.high %v2356_v32, %v2356_v32 }
 0x157   : > { %v895_v43 = vpack.c.bf16 %v858_v41, %v857_v40  ;;  %v1949_v44 = vpop.f32.mrb[56].mxu0 }
 0x158   : > { %v783_v45 = vadd.f32 %v1949_v44, %v2219_v36  ;;  %v774_v46 = vpop.f32.mrb[57].mxu0 }
 0x159   : > { %v775_v47 = vadd.f32 %v2219_v36, %v774_v46  ;;  %v1950_v48 = vpop.f32.mrb[58].mxu0  ;;  %2011 = vmatprep.mubr.msk.bf16.mxu1 %vm419_vm0, %v895_v43  ;;  %v1314_v46 = vld [vmem:[%s2322_s20 + $0x28] sm:$0xff] }
 0x15a   : > { %v786_v49 = vadd.f32 %v1950_v48, %v2219_v36  ;;  %v777_v50 = vpop.f32.mrb[59].mxu0  ;;  %2012 = vmatmul.mubr.msk.bf16.gmra.mrb[52].mxu1 %vm419_vm0, %v896_v42  ;;  %v863_v52 = vmax.f32 %v783_v45, 0.0  ;;  %v1316_v42 = vld [vmem:[%s2322_s20 + $0x38] sm:$0xff] }
 0x15b   : > { %v778_v51 = vadd.f32 %v2219_v36, %v777_v50  ;;  %v861_v54 = vmax.f32 %v775_v47, 0.0 }
 0x15c   : > { %v864_v53 = vmax.f32 %v786_v49, 0.0 }
 0x15d   : > { %v862_v55 = vmax.f32 %v778_v51, 0.0 }
 0x15e   : > { %v898_v56 = vpack.c.bf16 %v864_v53, %v863_v52 }
 0x15f   : > { %v897_v57 = vpack.c.bf16 %v862_v55, %v861_v54  ;;  %v1953_v58 = vpop.f32.mrb[60].mxu0 }
 0x160   : > { %v799_v59 = vadd.f32 %v1953_v58, %v2219_v36  ;;  %v790_v60 = vpop.f32.mrb[61].mxu0 }
 0x161   : > { %v791_v61 = vadd.f32 %v2219_v36, %v790_v60  ;;  %v1954_v62 = vpop.f32.mrb[62].mxu0  ;;  %2015 = vmatprep.mubr.msk.bf16.mxu1 %vm419_vm0, %v897_v57  ;;  %v1317_v60 = vld [vmem:[%s2322_s20 + $0x40] sm:$0xff] }
 0x162   : > { %v802_v63 = vadd.f32 %v1954_v62, %v2219_v36  ;;  %v793_v0 = vpop.f32.mrb[63].mxu0  ;;  %2016 = vmatmul.mubr.msk.bf16.gmra.mrb[56].mxu1 %vm419_vm0, %v898_v56  ;;  %v867_v2 = vmax.f32 %v799_v59, 0.0  ;;  %v1319_v56 = vld [vmem:[%s2322_s20 + $0x50] sm:$0xff] }
 0x163   : > { %v794_v1 = vadd.f32 %v2219_v36, %v793_v0  ;;  %v865_v4 = vmax.f32 %v791_v61, 0.0  ;;  %v2327_v36 = vld [vmem:[%s2632_s5] ss:$0 sm:$0xff]  ;;  %v1320_v0 = vld [vmem:[%s2322_s20 + $0x58] sm:$0xff] }
 0x164   : > { %v868_v3 = vmax.f32 %v802_v63, 0.0 }
 0x165   : > { %v866_v5 = vmax.f32 %v794_v1, 0.0 }
 0x166   : > { %v900_v6 = vpack.c.bf16 %v868_v3, %v867_v2 }
 0x167   : > { %v899_v7 = vpack.c.bf16 %v866_v5, %v865_v4  ;;  %v1318_v4 = vld [vmem:[%s2322_s20 + $0x48] sm:$0xff] }
 0x169   : > { %2019 = vmatprep.mubr.msk.bf16.mxu1 %vm419_vm0, %v899_v7 }
 0x16a   : > { %2020 = vmatmul.mubr.msk.bf16.gmra.mrb[60].mxu1 %vm419_vm0, %v900_v6 }
 0x16b   : > { %1621 = vmatprep.mubr.bf16.mxu1 %v1772_v38 }
 0x1c5   : > { %v1961_v8 = vpop.f32.mrb[0].mxu1 }
 0x1c6   : > { %v1063_v10 = vadd.f32 %v1961_v8, %v2327_v36  ;;  %v1054_v11 = vpop.f32.mrb[1].mxu1 }
 0x1c7   : > { %v1055_v13 = vadd.f32 %v2327_v36, %v1054_v11  ;;  %v1962_v14 = vpop.f32.mrb[2].mxu1 }
 0x1c8   : > { %v1375_v16 = vsub.f32 %v1063_v10, %v1311_v9  ;;  %v1066_v17 = vadd.f32 %v1962_v14, %v2327_v36  ;;  %v1057_v18 = vpop.f32.mrb[3].mxu1  ;;  %v1323_v14 = vld [vmem:[%s2322_s20 + $0x70] sm:$0xff] }
 0x1c9   : > { %v1373_v20 = vsub.f32 %v1055_v13, %v1309_v12  ;;  %v1058_v21 = vadd.f32 %v2327_v36, %v1057_v18  ;;  %v1321_v18 = vld [vmem:[%s2322_s20 + $0x60] sm:$0xff] }
 0x1ca   : > { %v1376_v22 = vsub.f32 %v1066_v17, %v1312_v15  ;;  %v2344_v26 = vmul.f32 %v1375_v16, %v1375_v16 }
 0x1cb   : > { %v1374_v24 = vsub.f32 %v1058_v21, %v1310_v19  ;;  %v2348_v28 = vmul.f32 %v1373_v20, %v1373_v20 }
 0x1cc   : > { %v2346_v27 = vmul.f32 %v1376_v22, %v1376_v22  ;;  %v1324_v22 = vld [vmem:[%s2322_s20 + $0x78] sm:$0xff] }
 0x1cd   : > { %v2350_v29 = vmul.f32 %v1374_v24, %v1374_v24  ;;  %v1965_v30 = vpop.f32.mrb[4].mxu1 }
 0x1ce   : > { %v1504_v33 = vpack.c.bf16 %v2346_v27, %v2344_v26  ;;  %v1079_v34 = vadd.f32 %v1965_v30, %v2327_v36  ;;  %v1070_v35 = vpop.f32.mrb[5].mxu1 }
 0x1cf   : > { %v1503_v39 = vpack.c.bf16 %v2350_v29, %v2348_v28  ;;  %v1071_v40 = vadd.f32 %v2327_v36, %v1070_v35  ;;  %v1966_v41 = vpop.f32.mrb[6].mxu1 }
 0x1d0   : > { %v1379_v43 = vsub.f32 %v1079_v34, %v1315_v31  ;;  %v1082_v44 = vadd.f32 %v1966_v41, %v2327_v36  ;;  %v1073_v45 = vpop.f32.mrb[7].mxu1  ;;  %v1322_v31 = vld [vmem:[%s2322_s20 + $0x68] sm:$0xff] }
 0x1d1   : > { %v1377_v47 = vsub.f32 %v1071_v40, %v1313_v37  ;;  %v1074_v48 = vadd.f32 %v2327_v36, %v1073_v45  ;;  %v1327_v45 = vld [vmem:[%s2322_s20 + $0x90] sm:$0xff] }
 0x1d2   : > { %v1380_v49 = vsub.f32 %v1082_v44, %v1316_v42  ;;  %v2371_v51 = vmul.f32 %v1379_v43, %v1379_v43 }
 0x1d3   : > { %v1378_v50 = vsub.f32 %v1074_v48, %v1314_v46  ;;  %v2375_v53 = vmul.f32 %v1377_v47, %v1377_v47 }
 0x1d4   : > { %v2373_v52 = vmul.f32 %v1380_v49, %v1380_v49  ;;  %v1325_v49 = vld [vmem:[%s2322_s20 + $0x80] sm:$0xff] }
 0x1d5   : > { %v2377_v54 = vmul.f32 %v1378_v50, %v1378_v50  ;;  %v1969_v55 = vpop.f32.mrb[8].mxu1 }
 0x1d6   : > { %v1506_v57 = vpack.c.bf16 %v2373_v52, %v2371_v51  ;;  %v1095_v58 = vadd.f32 %v1969_v55, %v2327_v36  ;;  %v1086_v59 = vpop.f32.mrb[9].mxu1 }
 0x1d7   : > { %v1505_v61 = vpack.c.bf16 %v2377_v54, %v2375_v53  ;;  %v1087_v62 = vadd.f32 %v2327_v36, %v1086_v59  ;;  %v1970_v63 = vpop.f32.mrb[10].mxu1 }
 0x1d8   : > { %v1383_v1 = vsub.f32 %v1095_v58, %v1319_v56  ;;  %v1098_v2 = vadd.f32 %v1970_v63, %v2327_v36  ;;  %v1089_v3 = vpop.f32.mrb[11].mxu1  ;;  %v1328_v58 = vld [vmem:[%s2322_s20 + $0x98] sm:$0xff]  ;;  %v1326_v63 = vld [vmem:[%s2322_s20 + $0x88] sm:$0xff] }
 0x1d9   : > { %v1381_v5 = vsub.f32 %v1087_v62, %v1317_v60  ;;  %v1090_v6 = vadd.f32 %v2327_v36, %v1089_v3 }
 0x1da   : > { %v1384_v7 = vsub.f32 %v1098_v2, %v1320_v0  ;;  %v2391_v9 = vmul.f32 %v1383_v1, %v1383_v1 }
 0x1db   : > { %v1382_v8 = vsub.f32 %v1090_v6, %v1318_v4  ;;  %v2395_v11 = vmul.f32 %v1381_v5, %v1381_v5 }
 0x1dc   : > { %v2393_v10 = vmul.f32 %v1384_v7, %v1384_v7 }
 0x1dd   : > { %v2397_v12 = vmul.f32 %v1382_v8, %v1382_v8  ;;  %v1973_v13 = vpop.f32.mrb[12].mxu1 }
 0x1de   : > { %v1508_v15 = vpack.c.bf16 %v2393_v10, %v2391_v9  ;;  %v1111_v16 = vadd.f32 %v1973_v13, %v2327_v36  ;;  %v1102_v17 = vpop.f32.mrb[13].mxu1  ;;  %v1331_v13 = vld [vmem:[%s2322_s20 + $0xb0] sm:$0xff] }
 0x1df   : > { %v1507_v19 = vpack.c.bf16 %v2397_v12, %v2395_v11  ;;  %v1103_v20 = vadd.f32 %v2327_v36, %v1102_v17  ;;  %v1974_v21 = vpop.f32.mrb[14].mxu1  ;;  %v1329_v17 = vld [vmem:[%s2322_s20 + $0xa0] sm:$0xff] }
 0x1e0   : > { %v1387_v24 = vsub.f32 %v1111_v16, %v1323_v14  ;;  %v1114_v25 = vadd.f32 %v1974_v21, %v2327_v36  ;;  %v1105_v30 = vpop.f32.mrb[15].mxu1 }
 0x1e1   : > { %v1385_v34 = vsub.f32 %v1103_v20, %v1321_v18  ;;  %v1106_v35 = vadd.f32 %v2327_v36, %v1105_v30 }
 0x1e2   : > { %v1388_v37 = vsub.f32 %v1114_v25, %v1324_v22  ;;  %v2411_v40 = vmul.f32 %v1387_v24, %v1387_v24  ;;  %v1332_v22 = vld [vmem:[%s2322_s20 + $0xb8] sm:$0xff] }
 0x1e3   : > { %v1386_v38 = vsub.f32 %v1106_v35, %v1322_v31  ;;  %v2415_v42 = vmul.f32 %v1385_v34, %v1385_v34  ;;  %v1330_v34 = vld [vmem:[%s2322_s20 + $0xa8] sm:$0xff] }
 0x1e4   : > { %v2413_v41 = vmul.f32 %v1388_v37, %v1388_v37 }
 0x1e5   : > { %v2417_v43 = vmul.f32 %v1386_v38, %v1386_v38  ;;  %v1977_v44 = vpop.f32.mrb[16].mxu1 }
 0x1e6   : > { %v1510_v46 = vpack.c.bf16 %v2413_v41, %v2411_v40  ;;  %v1127_v47 = vadd.f32 %v1977_v44, %v2327_v36  ;;  %v1118_v48 = vpop.f32.mrb[17].mxu1 }
 0x1e7   : > { %v1509_v50 = vpack.c.bf16 %v2417_v43, %v2415_v42  ;;  %v1119_v55 = vadd.f32 %v2327_v36, %v1118_v48  ;;  %v1978_v56 = vpop.f32.mrb[18].mxu1 }
 0x1e8   : > { %v1391_v59 = vsub.f32 %v1127_v47, %v1327_v45  ;;  %v1130_v60 = vadd.f32 %v1978_v56, %v2327_v36  ;;  %v1121_v62 = vpop.f32.mrb[19].mxu1  ;;  %v1335_v56 = vld [vmem:[%s2322_s20 + $0xd0] sm:$0xff] }
 0x1e9   : > { %v1389_v0 = vsub.f32 %v1119_v55, %v1325_v49  ;;  %v1122_v1 = vadd.f32 %v2327_v36, %v1121_v62  ;;  %v1336_v62 = vld [vmem:[%s2322_s20 + $0xd8] sm:$0xff] }
 0x1ea   : > { %v1392_v2 = vsub.f32 %v1130_v60, %v1328_v58  ;;  %v1455_v4 = vmul.f32 %v1391_v59, %v1391_v59  ;;  %v1333_v60 = vld [vmem:[%s2322_s20 + $0xc0] sm:$0xff] }
 0x1eb   : > { %v1390_v3 = vsub.f32 %v1122_v1, %v1326_v63  ;;  %v1453_v6 = vmul.f32 %v1389_v0, %v1389_v0 }
 0x1ec   : > { %v1456_v5 = vmul.f32 %v1392_v2, %v1392_v2 }
 0x1ed   : > { %v1454_v7 = vmul.f32 %v1390_v3, %v1390_v3  ;;  %v1981_v8 = vpop.f32.mrb[20].mxu1  ;;  %v1334_v3 = vld [vmem:[%s2322_s20 + $0xc8] sm:$0xff] }
 0x1ee   : > { %v1143_v14 = vadd.f32 %v1981_v8, %v2327_v36  ;;  %v1134_v16 = vpop.f32.mrb[21].mxu1  ;;  %v1512_v18 = vpack.c.bf16 %v1456_v5, %v1455_v4 }
 0x1ef   : > { %v1135_v20 = vadd.f32 %v2327_v36, %v1134_v16  ;;  %v1982_v21 = vpop.f32.mrb[22].mxu1  ;;  %v1511_v24 = vpack.c.bf16 %v1454_v7, %v1453_v6 }
 0x1f0   : > { %v1395_v25 = vsub.f32 %v1143_v14, %v1331_v13  ;;  %v1146_v30 = vadd.f32 %v1982_v21, %v2327_v36  ;;  %v1137_v31 = vpop.f32.mrb[23].mxu1  ;;  %v1339_v14 = vld [vmem:[%s2322_s20 + $0xf0] sm:$0xff] }
 0x1f1   : > { %v1393_v35 = vsub.f32 %v1135_v20, %v1329_v17  ;;  %v1138_v37 = vadd.f32 %v2327_v36, %v1137_v31  ;;  %1843 = vmatprep.subr.bf16.mxu0 %v1511_v24  ;;  %v1340_v20 = vld [vmem:[%s2322_s20 + $0xf8] sm:$0xff] }
 0x1f2   : > { %v1396_v38 = vsub.f32 %v1146_v30, %v1332_v22  ;;  %1844 = vmatpush3.bf16.msra.mxu0 %v1503_v39  ;;  %v1459_v45 = vmul.f32 %v1395_v25, %v1395_v25  ;;  %v1338_v30 = vld [vmem:[%s2322_s20 + $0xe8] sm:$0xff] }
 0x1f3   : > { %v1394_v44 = vsub.f32 %v1138_v37, %v1330_v34  ;;  %1845 = vmatprep.subr.bf16.mxu0 %v1512_v18  ;;  %v1457_v48 = vmul.f32 %v1393_v35, %v1393_v35  ;;  %v1337_v18 = vld [vmem:[%s2322_s20 + $0xe0] sm:$0xff] }
 0x1f4   : > { %v1460_v47 = vmul.f32 %v1396_v38, %v1396_v38 }
 0x1f5   : > { %v1458_v49 = vmul.f32 %v1394_v44, %v1394_v44  ;;  %v1985_v55 = vpop.f32.mrb[24].mxu1 }
 0x1f6   : > { %v1159_v58 = vadd.f32 %v1985_v55, %v2327_v36  ;;  %v1150_v59 = vpop.f32.mrb[25].mxu1  ;;  %1846 = vmatpush3.bf16.msra.mxu0 %v1504_v33  ;;  %v1514_v28 = vpack.c.bf16 %v1460_v47, %v1459_v45  ;;  %v1343_v45 = vld [vmem:[%s2322_s20 + $0x110] sm:$0xff]  ;;  %v1344_v55 = vld [vmem:[%s2322_s20 + $0x118] sm:$0xff] }
 0x1f7   : > { %v1151_v29 = vadd.f32 %v2327_v36, %v1150_v59  ;;  %v1986_v39 = vpop.f32.mrb[26].mxu1  ;;  %v1513_v63 = vpack.c.bf16 %v1458_v49, %v1457_v48  ;;  %v1341_v49 = vld [vmem:[%s2322_s20 + $0x100] sm:$0xff] }
 0x1f8   : > { %v1399_v0 = vsub.f32 %v1159_v58, %v1335_v56  ;;  %v1162_v1 = vadd.f32 %v1986_v39, %v2327_v36  ;;  %v1153_v2 = vpop.f32.mrb[27].mxu1 }
 0x1f9   : > { %v1397_v4 = vsub.f32 %v1151_v29, %v1333_v60  ;;  %v1154_v5 = vadd.f32 %v2327_v36, %v1153_v2  ;;  %1847 = vmatprep.subr.bf16.mxu0 %v1513_v63  ;;  %v1347_v2 = vld [vmem:[%s2322_s20 + $0x130] sm:$0xff] }
 0x1fa   : > { %v1400_v6 = vsub.f32 %v1162_v1, %v1336_v62  ;;  %1848 = vmatpush3.bf16.msra.mxu0 %v1505_v61  ;;  %v1463_v27 = vmul.f32 %v1399_v0, %v1399_v0 }
 0x1fb   : > { %v1398_v26 = vsub.f32 %v1154_v5, %v1334_v3  ;;  %1849 = vmatprep.subr.bf16.mxu0 %v1514_v28  ;;  %v1461_v7 = vmul.f32 %v1397_v4, %v1397_v4  ;;  %v1342_v28 = vld [vmem:[%s2322_s20 + $0x108] sm:$0xff]  ;;  %v1769_v3 = vcombine.low %v2340_v23, %v2340_v23  ;;  %v1345_v4 = vld [vmem:[%s2322_s20 + $0x120] sm:$0xff] }
 0x1fc   : > { %v1464_v33 = vmul.f32 %v1400_v6, %v1400_v6 }
 0x1fd   : > { %v1462_v8 = vmul.f32 %v1398_v26, %v1398_v26  ;;  %v1989_v13 = vpop.f32.mrb[28].mxu1 }
 0x1fe   : > { %v1175_v16 = vadd.f32 %v1989_v13, %v2327_v36  ;;  %v1166_v17 = vpop.f32.mrb[29].mxu1  ;;  %1850 = vmatpush3.bf16.msra.mxu0 %v1506_v57  ;;  %v1516_v53 = vpack.c.bf16 %v1464_v33, %v1463_v27  ;;  %v1348_v27 = vld [vmem:[%s2322_s20 + $0x138] sm:$0xff] }
 0x1ff   : > { %v1167_v54 = vadd.f32 %v2327_v36, %v1166_v17  ;;  %v1990_v61 = vpop.f32.mrb[30].mxu1  ;;  %v1515_v21 = vpack.c.bf16 %v1462_v8, %v1461_v7  ;;  %v1346_v8 = vld [vmem:[%s2322_s20 + $0x128] sm:$0xff] }
 0x200   : > { %v1403_v22 = vsub.f32 %v1175_v16, %v1339_v14  ;;  %v1178_v24 = vadd.f32 %v1990_v61, %v2327_v36  ;;  %v1169_v25 = vpop.f32.mrb[31].mxu1 }
 0x201   : > { %v1401_v31 = vsub.f32 %v1167_v54, %v1337_v18  ;;  %v1170_v34 = vadd.f32 %v2327_v36, %v1169_v25  ;;  %1851 = vmatprep.subr.bf16.mxu0 %v1515_v21  ;;  %v1351_v54 = vld [vmem:[%s2322_s20 + $0x150] sm:$0xff] }
 0x202   : > { %v1404_v35 = vsub.f32 %v1178_v24, %v1340_v20  ;;  %1852 = vmatpush3.bf16.msra.mxu0 %v1507_v19  ;;  %v1467_v52 = vmul.f32 %v1403_v22, %v1403_v22  ;;  %v1349_v22 = vld [vmem:[%s2322_s20 + $0x140] sm:$0xff] }
 0x203   : > { %v1402_v51 = vsub.f32 %v1170_v34, %v1338_v30  ;;  %1853 = vmatprep.subr.bf16.mxu0 %v1516_v53  ;;  %v1465_v37 = vmul.f32 %v1401_v31, %v1401_v31  ;;  %v1352_v31 = vld [vmem:[%s2322_s20 + $0x158] sm:$0xff] }
 0x204   : > { %v1468_v57 = vmul.f32 %v1404_v35, %v1404_v35 }
 0x205   : > { %v1466_v38 = vmul.f32 %v1402_v51, %v1402_v51  ;;  %v1993_v44 = vpop.f32.mrb[32].mxu1 }
 0x206   : > { %v1191_v47 = vadd.f32 %v1993_v44, %v2327_v36  ;;  %v1182_v48 = vpop.f32.mrb[33].mxu1  ;;  %1854 = vmatpush3.bf16.msra.mxu0 %v1508_v15  ;;  %v1518_v11 = vpack.c.bf16 %v1468_v57, %v1467_v52  ;;  %v1350_v52 = vld [vmem:[%s2322_s20 + $0x148] sm:$0xff] }
 0x207   : > { %v1183_v12 = vadd.f32 %v2327_v36, %v1182_v48  ;;  %v1994_v19 = vpop.f32.mrb[34].mxu1  ;;  %v1517_v56 = vpack.c.bf16 %v1466_v38, %v1465_v37 }
 0x208   : > { %v1407_v58 = vsub.f32 %v1191_v47, %v1343_v45  ;;  %v1194_v59 = vadd.f32 %v1994_v19, %v2327_v36  ;;  %v1185_v60 = vpop.f32.mrb[35].mxu1 }
 0x209   : > { %v1405_v29 = vsub.f32 %v1183_v12, %v1341_v49  ;;  %v1186_v39 = vadd.f32 %v2327_v36, %v1185_v60  ;;  %1855 = vmatprep.subr.bf16.mxu0 %v1517_v56  ;;  %v1355_v12 = vld [vmem:[%s2322_s20 + $0x170] sm:$0xff] }
 0x20a   : > { %v1408_v62 = vsub.f32 %v1194_v59, %v1344_v55  ;;  %1856 = vmatpush3.bf16.msra.mxu0 %v1509_v50  ;;  %v2484_v10 = vmul.f32 %v1407_v58, %v1407_v58  ;;  %v1353_v58 = vld [vmem:[%s2322_s20 + $0x160] sm:$0xff] }
 0x20b   : > { %v1406_v9 = vsub.f32 %v1186_v39, %v1342_v28  ;;  %1857 = vmatprep.subr.bf16.mxu0 %v1518_v11  ;;  %v2488_v63 = vmul.f32 %v1405_v29, %v1405_v29  ;;  %v1356_v29 = vld [vmem:[%s2322_s20 + $0x178] sm:$0xff] }
 0x20c   : > { %v2486_v15 = vmul.f32 %v1408_v62, %v1408_v62 }
 0x20d   : > { %v2490_v0 = vmul.f32 %v1406_v9, %v1406_v9  ;;  %v1997_v1 = vpop.f32.mrb[36].mxu1 }
 0x20e   : > { %v1520_v42 = vpack.c.bf16 %v2486_v15, %v2484_v10  ;;  %v1207_v43 = vadd.f32 %v1997_v1, %v2327_v36  ;;  %v1198_v50 = vpop.f32.mrb[37].mxu1  ;;  %1858 = vmatpush3.bf16.msra.mxu0 %v1510_v46  ;;  %v1354_v1 = vld [vmem:[%s2322_s20 + $0x168] sm:$0xff] }
 0x20f   : > { %v1519_v5 = vpack.c.bf16 %v2490_v0, %v2488_v63  ;;  %v1199_v6 = vadd.f32 %v2327_v36, %v1198_v50  ;;  %v1998_v26 = vpop.f32.mrb[38].mxu1 }
 0x210   : > { %v1411_v23 = vsub.f32 %v1207_v43, %v1347_v2  ;;  %v1210_v33 = vadd.f32 %v1998_v26, %v2327_v36  ;;  %v1201_v7 = vpop.f32.mrb[39].mxu1 }
 0x211   : > { %v1409_v13 = vsub.f32 %v1199_v6, %v1345_v4  ;;  %v1202_v14 = vadd.f32 %v2327_v36, %v1201_v7  ;;  %1582 = vmatmul.mubr.bf16.vlgmr.msra.gmra.mrb[64].mxu0 %v1769_v3 }
 0x212   : > { %v1412_v40 = vsub.f32 %v1210_v33, %v1348_v27  ;;  %v2509_v46 = vmul.f32 %v1411_v23, %v1411_v23  ;;  %v1359_v33 = vld [vmem:[%s2322_s20 + $0x190] sm:$0xff] }
 0x213   : > { %v1410_v41 = vsub.f32 %v1202_v14, %v1346_v8  ;;  %v2513_v17 = vmul.f32 %v1409_v13, %v1409_v13  ;;  %v1357_v14 = vld [vmem:[%s2322_s20 + $0x180] sm:$0xff] }
 0x214   : > { %v2511_v16 = vmul.f32 %v1412_v40, %v1412_v40 }
 0x215   : > { %v2515_v18 = vmul.f32 %v1410_v41, %v1410_v41  ;;  %v2001_v53 = vpop.f32.mrb[40].mxu1 }
 0x216   : > { %v1522_v61 = vpack.c.bf16 %v2511_v16, %v2509_v46  ;;  %v1223_v20 = vadd.f32 %v2001_v53, %v2327_v36  ;;  %v1214_v21 = vpop.f32.mrb[41].mxu1 }
 0x217   : > { %v1521_v24 = vpack.c.bf16 %v2515_v18, %v2513_v17  ;;  %v1215_v25 = vadd.f32 %v2327_v36, %v1214_v21  ;;  %v2002_v30 = vpop.f32.mrb[42].mxu1 }
 0x218   : > { %v1415_v34 = vsub.f32 %v1223_v20, %v1351_v54  ;;  %v1226_v35 = vadd.f32 %v2002_v30, %v2327_v36  ;;  %v1217_v51 = vpop.f32.mrb[43].mxu1  ;;  %v1360_v54 = vld [vmem:[%s2322_s20 + $0x198] sm:$0xff] }
 0x219   : > { %v1413_v57 = vsub.f32 %v1215_v25, %v1349_v22  ;;  %v1218_v37 = vadd.f32 %v2327_v36, %v1217_v51  ;;  %v1358_v25 = vld [vmem:[%s2322_s20 + $0x188] sm:$0xff] }
 0x21a   : > { %v1416_v38 = vsub.f32 %v1226_v35, %v1352_v31  ;;  %v2529_v45 = vmul.f32 %v1415_v34, %v1415_v34 }
 0x21b   : > { %v1414_v44 = vsub.f32 %v1218_v37, %v1350_v52  ;;  %v2533_v48 = vmul.f32 %v1413_v57, %v1413_v57 }
 0x21c   : > { %v2531_v47 = vmul.f32 %v1416_v38, %v1416_v38 }
 0x21d   : > { %v2535_v49 = vmul.f32 %v1414_v44, %v1414_v44  ;;  %v2005_v11 = vpop.f32.mrb[44].mxu1  ;;  %v1363_v44 = vld [vmem:[%s2322_s20 + $0x1b0] sm:$0xff] }
 0x21e   : > { %v1524_v19 = vpack.c.bf16 %v2531_v47, %v2529_v45  ;;  %v1239_v55 = vadd.f32 %v2005_v11, %v2327_v36  ;;  %v1230_v56 = vpop.f32.mrb[45].mxu1 }
 0x21f   : > { %v1523_v59 = vpack.c.bf16 %v2535_v49, %v2533_v48  ;;  %v1231_v60 = vadd.f32 %v2327_v36, %v1230_v56  ;;  %v2006_v28 = vpop.f32.mrb[46].mxu1  ;;  %v1771_v48 = vcombine.low %v2356_v32, %v2356_v32 }
 0x220   : > { %v1419_v39 = vsub.f32 %v1239_v55, %v1355_v12  ;;  %v1242_v62 = vadd.f32 %v2006_v28, %v2327_v36  ;;  %v1233_v9 = vpop.f32.mrb[47].mxu1  ;;  %v1361_v55 = vld [vmem:[%s2322_s20 + $0x1a0] sm:$0xff]  ;;  %v1364_v28 = vld [vmem:[%s2322_s20 + $0x1b8] sm:$0xff] }
 0x221   : > { %v1417_v2 = vsub.f32 %v1231_v60, %v1353_v58  ;;  %v1234_v3 = vadd.f32 %v2327_v36, %v1233_v9 }
 0x222   : > { %v1420_v43 = vsub.f32 %v1242_v62, %v1356_v29  ;;  %v2549_v4 = vmul.f32 %v1419_v39, %v1419_v39 }
 0x223   : > { %v1418_v50 = vsub.f32 %v1234_v3, %v1354_v1  ;;  %v2553_v26 = vmul.f32 %v1417_v2, %v1417_v2  ;;  %v1362_v1 = vld [vmem:[%s2322_s20 + $0x1a8] sm:$0xff] }
 0x224   : > { %v2551_v6 = vmul.f32 %v1420_v43, %v1420_v43 }
 0x225   : > { %v2555_v27 = vmul.f32 %v1418_v50, %v1418_v50  ;;  %v2009_v23 = vpop.f32.mrb[48].mxu1 }
 0x226   : > { %v1526_v7 = vpack.c.bf16 %v2551_v6, %v2549_v4  ;;  %v1255_v8 = vadd.f32 %v2009_v23, %v2327_v36  ;;  %v1246_v13 = vpop.f32.mrb[49].mxu1 }
 0x227   : > { %v1525_v40 = vpack.c.bf16 %v2555_v27, %v2553_v26  ;;  %v1247_v41 = vadd.f32 %v2327_v36, %v1246_v13  ;;  %v2010_v53 = vpop.f32.mrb[50].mxu1 }
 0x228   : > { %v1423_v20 = vsub.f32 %v1255_v8, %v1359_v33  ;;  %v1258_v21 = vadd.f32 %v2010_v53, %v2327_v36  ;;  %v1249_v22 = vpop.f32.mrb[51].mxu1 }
 0x229   : > { %v1421_v30 = vsub.f32 %v1247_v41, %v1357_v14  ;;  %v1250_v31 = vadd.f32 %v2327_v36, %v1249_v22  ;;  %v1367_v41 = vld [vmem:[%s2322_s20 + $0x1d0] sm:$0xff] }
 0x22a   : > { %v1424_v34 = vsub.f32 %v1258_v21, %v1360_v54  ;;  %v1487_v51 = vmul.f32 %v1423_v20, %v1423_v20  ;;  %v1365_v20 = vld [vmem:[%s2322_s20 + $0x1c0] sm:$0xff]  ;;  %v1368_v21 = vld [vmem:[%s2322_s20 + $0x1d8] sm:$0xff] }
 0x22b   : > { %v1422_v35 = vsub.f32 %v1250_v31, %v1358_v25  ;;  %v1485_v57 = vmul.f32 %v1421_v30, %v1421_v30 }
 0x22c   : > { %v1488_v52 = vmul.f32 %v1424_v34, %v1424_v34  ;;  %v1366_v34 = vld [vmem:[%s2322_s20 + $0x1c8] sm:$0xff] }
 0x22d   : > { %v1486_v37 = vmul.f32 %v1422_v35, %v1422_v35  ;;  %v2013_v38 = vpop.f32.mrb[52].mxu1 }
 0x22e   : > { %v1271_v11 = vadd.f32 %v2013_v38, %v2327_v36  ;;  %v1262_v12 = vpop.f32.mrb[53].mxu1  ;;  %v1528_v56 = vpack.c.bf16 %v1488_v52, %v1487_v51 }
 0x22f   : > { %v1263_v58 = vadd.f32 %v2327_v36, %v1262_v12  ;;  %v2014_v60 = vpop.f32.mrb[54].mxu1  ;;  %v1527_v29 = vpack.c.bf16 %v1486_v37, %v1485_v57 }
 0x230   : > { %v1427_v39 = vsub.f32 %v1271_v11, %v1363_v44  ;;  %v1274_v62 = vadd.f32 %v2014_v60, %v2327_v36  ;;  %v1265_v9 = vpop.f32.mrb[55].mxu1  ;;  %v1371_v44 = vld [vmem:[%s2322_s20 + $0x1f0] sm:$0xff] }
 0x231   : > { %v1425_v2 = vsub.f32 %v1263_v58, %v1361_v55  ;;  %v1266_v3 = vadd.f32 %v2327_v36, %v1265_v9  ;;  %1865 = vmatprep.subr.bf16.mxu1 %v1527_v29  ;;  %v1369_v55 = vld [vmem:[%s2322_s20 + $0x1e0] sm:$0xff] }
 0x232   : > { %v1428_v43 = vsub.f32 %v1274_v62, %v1364_v28  ;;  %1866 = vmatpush3.bf16.msra.mxu1 %v1519_v5  ;;  %v1491_v23 = vmul.f32 %v1427_v39, %v1427_v39  ;;  %v1370_v39 = vld [vmem:[%s2322_s20 + $0x1e8] sm:$0xff] }
 0x233   : > { %v1426_v50 = vsub.f32 %v1266_v3, %v1362_v1  ;;  %1867 = vmatprep.subr.bf16.mxu1 %v1528_v56  ;;  %v1489_v8 = vmul.f32 %v1425_v2, %v1425_v2  ;;  %v1372_v56 = vld [vmem:[%s2322_s20 + $0x1f8] sm:$0xff] }
 0x234   : > { %v1492_v33 = vmul.f32 %v1428_v43, %v1428_v43 }
 0x235   : > { %v1490_v13 = vmul.f32 %v1426_v50, %v1426_v50  ;;  %v2017_v14 = vpop.f32.mrb[56].mxu1 }
 0x236   : > { %v1287_v53 = vadd.f32 %v2017_v14, %v2327_v36  ;;  %v1278_v54 = vpop.f32.mrb[57].mxu1  ;;  %1868 = vmatpush3.bf16.msra.mxu1 %v1520_v42  ;;  %v1530_v63 = vpack.c.bf16 %v1492_v33, %v1491_v23 }
 0x237   : > { %v1279_v0 = vadd.f32 %v2327_v36, %v1278_v54  ;;  %v2018_v5 = vpop.f32.mrb[58].mxu1  ;;  %v1529_v22 = vpack.c.bf16 %v1490_v13, %v1489_v8 }
 0x238   : > { %v1431_v25 = vsub.f32 %v1287_v53, %v1367_v41  ;;  %v1290_v30 = vadd.f32 %v2018_v5, %v2327_v36  ;;  %v1281_v31 = vpop.f32.mrb[59].mxu1 }
 0x239   : > { %v1429_v35 = vsub.f32 %v1279_v0, %v1365_v20  ;;  %v1282_v51 = vadd.f32 %v2327_v36, %v1281_v31  ;;  %1869 = vmatprep.subr.bf16.mxu1 %v1529_v22 }
 0x23a   : > { %v1432_v52 = vsub.f32 %v1290_v30, %v1368_v21  ;;  %1870 = vmatpush3.bf16.msra.mxu1 %v1521_v24  ;;  %v1495_v15 = vmul.f32 %v1431_v25, %v1431_v25 }
 0x23b   : > { %v1430_v10 = vsub.f32 %v1282_v51, %v1366_v34  ;;  %1871 = vmatprep.subr.bf16.mxu1 %v1530_v63  ;;  %v1493_v57 = vmul.f32 %v1429_v35, %v1429_v35 }
 0x23c   : > { %v1496_v42 = vmul.f32 %v1432_v52, %v1432_v52 }
 0x23d   : > { %v1494_v37 = vmul.f32 %v1430_v10, %v1430_v10  ;;  %v2021_v38 = vpop.f32.mrb[60].mxu1 }
 0x23e   : > { %v1303_v11 = vadd.f32 %v2021_v38, %v2327_v36  ;;  %v1294_v12 = vpop.f32.mrb[61].mxu1  ;;  %1872 = vmatpush3.bf16.msra.mxu1 %v1522_v61  ;;  %v1532_v17 = vpack.c.bf16 %v1496_v42, %v1495_v15 }
 0x23f   : > { %v1295_v18 = vadd.f32 %v2327_v36, %v1294_v12  ;;  %v2022_v24 = vpop.f32.mrb[62].mxu1  ;;  %v1531_v58 = vpack.c.bf16 %v1494_v37, %v1493_v57 }
 0x240   : > { %v1435_v60 = vsub.f32 %v1303_v11, %v1371_v44  ;;  %v1306_v28 = vadd.f32 %v2022_v24, %v2327_v36  ;;  %v1297_v29 = vpop.f32.mrb[63].mxu1 }
 0x241   : > { %v1433_v62 = vsub.f32 %v1295_v18, %v1369_v55  ;;  %v1298_v9 = vadd.f32 %v2327_v36, %v1297_v29  ;;  %1873 = vmatprep.subr.bf16.mxu1 %v1531_v58 }
 0x242   : > { %v1436_v1 = vsub.f32 %v1306_v28, %v1372_v56  ;;  %1874 = vmatpush3.bf16.msra.mxu1 %v1523_v59  ;;  %v1499_v16 = vmul.f32 %v1435_v60, %v1435_v60 }
 0x243   : > { %v1434_v46 = vsub.f32 %v1298_v9, %v1370_v39  ;;  %1875 = vmatprep.subr.bf16.mxu1 %v1532_v17  ;;  %v1497_v2 = vmul.f32 %v1433_v62, %v1433_v62 }
 0x244   : > { %v1500_v61 = vmul.f32 %v1436_v1, %v1436_v1 }
 0x245   : > { %v1498_v3 = vmul.f32 %v1434_v46, %v1434_v46 }
 0x246   : > { %1876 = vmatpush3.bf16.msra.mxu1 %v1524_v19  ;;  %v1534_v43 = vpack.c.bf16 %v1500_v61, %v1499_v16 }
 0x247   : > { %v1533_v36 = vpack.c.bf16 %v1498_v3, %v1497_v2 }
 0x249   : > { %1877 = vmatprep.subr.bf16.mxu1 %v1533_v36 }
 0x24a   : > { %1878 = vmatpush3.bf16.msra.mxu1 %v1525_v40 }
 0x24b   : > { %1879 = vmatprep.subr.bf16.mxu1 %v1534_v43 }
 0x24e   : > { %1880 = vmatpush3.bf16.msra.mxu1 %v1526_v7 }
 0x251   : > { %1622 = vmatmul.mubr.bf16.vlgmr.msra.gmra.mrb[64].mxu1 %v1771_v48 }
 0x2e4   : > { %v1859_v49 = vpop.f32.mrb[64].mxu0 }
 0x2e5   : > { %v1860_v45 = vpop.f32.mrb[65].mxu0 }
 0x2e6   : > { %v1861_v47 = vadd.f32 %v1860_v45, %v1859_v49  ;;  %v1862_v19 = vpop.f32.mrb[66].mxu0 }
 0x2e7   : > { %v1863_v59 = vpop.f32.mrb[67].mxu0 }
 0x324   : > { %v1881_v50 = vpop.f32.mrb[64].mxu1 }
 0x325   : > { %v1882_v23 = vpop.f32.mrb[65].mxu1 }
 0x326   : > { %v1883_v26 = vadd.f32 %v1882_v23, %v1881_v50  ;;  %v1884_v27 = vpop.f32.mrb[66].mxu1 }
 0x327   : > { %v1885_v32 = vpop.f32.mrb[67].mxu1 }
 0x328   : > { %v1624_v4 = vadd.f32 %v1883_v26, %v1861_v47 }
 0x32a   : > { %1630 = vst.msk [vmem:[%s298_s8] sm:$0x1] %vm1629_vm1, %v1624_v4 }
 0x32b PF: > { %s17_s24 = sadd.s32 1, %s2045_s24  }
 0x32c   : > { %p14_p5 = scmp.ge.s32.totalorder %s17_s24, 6  }
 0x32e   :  { %16 = sbr.rel (!%p14_p5) target bundleno = 1 (0x1), region = 81 }

</bundles_post_ra>
